<compile_context>
chip_gen: v5e
topology: v5e:2x2
jax: 0.10.0
libtpu: 0.0.40
codegen_flags: <defaults>
</compile_context>

<pallas_src>
import jax
import jax.numpy as jnp
from jax.experimental import pallas as pl
from jax.experimental.pallas import tpu as pltpu

EPS = 1e-5
PADR = 8   # halo rows above the data: keeps DMA destination / interior stores tile-aligned


def _round_up(v, m):
    return ((v + m - 1) // m) * m


# ----------------------------- wrapper-side helpers ---------------------------

def _band_weights(w_oihw, W):
    """PyTorch (Cout, Cin, 3, 3) conv weight -> 3 block-banded (W*Cin, W*Cout) mats.

    B[kh][wi*Cin+ci, wo*Cout+co] = w[co, ci, kh, kw] with kw = wi - wo + 1 (0 outside),
    so `lane_packed_row(x[h+kh-1]) @ B[kh]` summed over kh is the full 3x3 SAME conv
    with the W axis folded into lanes; the W-boundary zero padding is encoded by the
    missing bands (no in-kernel rolls / masks / concatenates needed).
    """
    w = w_oihw.astype(jnp.float32)
    bands = []
    for kh in range(3):
        mat = sum(jnp.kron(jnp.eye(W, W, k=1 - kw, dtype=jnp.float32),
                           jnp.transpose(w[:, :, kh, kw]))        # (Cin, Cout) block
                  for kw in range(3))
        bands.append(mat)
    return jnp.stack(bands)                                        # (3, W*Cin, W*Cout)


# --------------------------------- kernel -------------------------------------

def _make_kernel(N, H, W, C, HP):
    """Build the fused BasicBlock kernel for static dims (all-lane-packed)."""
    WC = W * C
    M = N * H
    inv_m = 1.0 / float(N * H * W)

    def _unfold(v_c, unfold):
        # (1, C) -> (1, W*C): per-channel value broadcast into the lane-packed row.
        return jnp.dot(v_c, unfold, preferred_element_type=jnp.float32)

    def _bn_train(y, gamma, beta, fold, unfold):
        """Training-mode BatchNorm2d on lane-packed (M, W*C), two-pass stats."""
        mean_c = jnp.dot(jnp.sum(y, axis=0, keepdims=True), fold,
                         preferred_element_type=jnp.float32) * inv_m      # (1, C)
        d = y - _unfold(mean_c, unfold)
        var_c = jnp.dot(jnp.sum(d * d, axis=0, keepdims=True), fold,
                        preferred_element_type=jnp.float32) * inv_m       # biased var
        scale_c = gamma * jax.lax.rsqrt(var_c + EPS)
        return d * _unfold(scale_c, unfold) + _unfold(beta, unfold)

    def _conv3x3(pad_ref, wb_ref):
        """3x3 SAME conv = 3 lane-dense banded matmuls (K = W*C), f32 accumulate."""
        acc = None
        for kh in range(3):
            lo = PADR - 1 + kh
            tap = pad_ref[:, lo:lo + H, :].reshape(M, WC)
            part = jnp.dot(tap, wb_ref[kh], preferred_element_type=jnp.float32)
            acc = part if acc is None else acc + part
        return acc

    def kernel(x_hbm, w1_ref, w2_ref, g1_ref, b1_ref, g2_ref, b2_ref,
               fold_ref, unfold_ref, out_ref, xpad_ref, midpad_ref, dma_sem):
        # DMA x straight from HBM into the tile-aligned interior of the padded scratch.
        cp = pltpu.make_async_copy(x_hbm, xpad_ref.at[:, PADR:PADR + H, :], dma_sem)
        cp.start()

        # Zero ONLY the halo rows (disjoint from the in-flight DMA region).
        ztop = jnp.zeros((N, PADR, WC), jnp.float32)
        zbot = jnp.zeros((N, HP - PADR - H, WC), jnp.float32)
        xpad_ref[:, 0:PADR, :] = ztop
        xpad_ref[:, PADR + H:HP, :] = zbot
        midpad_ref[:, 0:PADR, :] = ztop
        midpad_ref[:, PADR + H:HP, :] = zbot

        fold = fold_ref[...]
        unfold = unfold_ref[...]

        cp.wait()

        # conv1 -> bn1 -> relu  (values stay lane-packed (N*H, W*C))
        y1 = _conv3x3(xpad_ref, w1_ref)
        mid = jnp.maximum(_bn_train(y1, g1_ref[...], b1_ref[...], fold, unfold), 0.0)

        # re-pad the intermediate in VMEM (aligned interior store; halos already zero)
        midpad_ref[:, PADR:PADR + H, :] = mid.reshape(N, H, WC)

        # conv2 -> bn2 -> (+identity) -> relu ; lane-dense unmasked output store
        y2 = _bn_train(_conv3x3(midpad_ref, w2_ref),
                       g2_ref[...], b2_ref[...], fold, unfold)
        identity = xpad_ref[:, PADR:PADR + H, :].reshape(M, WC)
        out_ref[...] = jnp.maximum(y2 + identity, 0.0)

    return kernel


# --------------------------------- wrapper ------------------------------------

_VMEM = pl.BlockSpec(memory_space=pltpu.MemorySpace.VMEM)
_ANY = pl.BlockSpec(memory_space=pl.ANY)


def basic_block_forward(x_nchw, params):
    """BasicBlock forward. x_nchw: (N, C, H, W) f32 (PyTorch layout)."""
    x_nchw = x_nchw.astype(jnp.float32)
    N, C, H, W = x_nchw.shape
    WC = W * C
    HP = PADR + _round_up(H + 1, 8)            # per-image padded rows (tile aligned)

    # Lane-packed layout: rows = (N, H), lanes = W*C (toy: 16*8 = 128, fully dense).
    x_packed = jnp.transpose(x_nchw, (0, 2, 3, 1)).reshape(N, H, WC)

    w1b = _band_weights(params["conv1_w"], W)  # (3, W*C, W*C)
    w2b = _band_weights(params["conv2_w"], W)
    g1 = params["bn1_g"].reshape(1, C).astype(jnp.float32)
    b1 = params["bn1_b"].reshape(1, C).astype(jnp.float32)
    g2 = params["bn2_g"].reshape(1, C).astype(jnp.float32)
    b2 = params["bn2_b"].reshape(1, C).astype(jnp.float32)

    eye_c = jnp.eye(C, dtype=jnp.float32)
    fold = jnp.tile(eye_c, (W, 1))             # (W*C, C): lane-packed -> per-channel sum
    unfold = jnp.tile(eye_c, (1, W))           # (C, W*C): per-channel -> lane-packed bcast

    M = N * H
    conv_flops = 2 * 3 * 2 * M * WC * WC                  # two convs x three banded matmuls
    bn_flops = 2 * (8 * M * WC + 8 * WC * C)              # stats + normalize (approx)
    hbm_bytes = 4 * (2 * M * WC + 2 * 3 * WC * WC + 2 * WC * C + 4 * C)
    scratch_bytes = 4 * 2 * 2 * N * HP * WC               # write + read of both padded scratches
    cost = pl.CostEstimate(flops=conv_flops + bn_flops,
                           transcendentals=2 * C,
                           bytes_accessed=hbm_bytes + scratch_bytes)

    out_packed = pl.pallas_call(
        _make_kernel(N, H, W, C, HP),
        out_shape=jax.ShapeDtypeStruct((M, WC), jnp.float32),   # lane-dense HBM output
        in_specs=[_ANY] + [_VMEM] * 8,
        out_specs=_VMEM,
        scratch_shapes=[
            pltpu.VMEM((N, HP, WC), jnp.float32),   # padded input (identity read from here)
            pltpu.VMEM((N, HP, WC), jnp.float32),   # padded conv1 output
            pltpu.SemaphoreType.DMA,
        ],
        compiler_params=pltpu.CompilerParams(vmem_limit_bytes=32 * 1024 * 1024),
        cost_estimate=cost,
    )(x_packed, w1b, w2b, g1, b1, g2, b2, fold, unfold)

    return jnp.transpose(out_packed.reshape(N, H, W, C), (0, 3, 1, 2))   # back to NCHW


# ------------------------------ pure-JAX reference ----------------------------

def basic_block_reference(x_nchw, params):
    x = jnp.transpose(x_nchw, (0, 2, 3, 1)).astype(jnp.float32)

    def conv(y, w_oihw):
        w = jnp.transpose(w_oihw, (2, 3, 1, 0)).astype(jnp.float32)  # HWIO
        return jax.lax.conv_general_dilated(
            y, w, window_strides=(1, 1), padding="SAME",
            dimension_numbers=("NHWC", "HWIO", "NHWC"))

    def bn(y, g, b):
        mu = y.mean(axis=(0, 1, 2), keepdims=True)
        var = ((y - mu) ** 2).mean(axis=(0, 1, 2), keepdims=True)
        return (g.reshape(1, 1, 1, -1) * (y - mu) / jnp.sqrt(var + EPS)
                + b.reshape(1, 1, 1, -1))

    out = jnp.maximum(bn(conv(x, params["conv1_w"]),
                         params["bn1_g"], params["bn1_b"]), 0.0)
    out = bn(conv(out, params["conv2_w"]), params["bn2_g"], params["bn2_b"])
    out = jnp.maximum(out + x, 0.0)
    return jnp.transpose(out, (0, 3, 1, 2))


# ----------------------------------- main -------------------------------------

if __name__ == "__main__":
    N, C, H, W = 2, 8, 16, 16  # inplanes = planes = 8, stride = 1, downsample = None

    key = jax.random.PRNGKey(0)
    kx, kw1, kw2, kg1, kb1, kg2, kb2 = jax.random.split(key, 7)

    x = jax.random.normal(kx, (N, C, H, W), jnp.float32)

    params = {
        # PyTorch layouts: conv (Cout, Cin, kh, kw), BN affine (C,)
        "conv1_w": 0.1 * jax.random.normal(kw1, (C, C, 3, 3), jnp.float32),
        "conv2_w": 0.1 * jax.random.normal(kw2, (C, C, 3, 3), jnp.float32),
        "bn1_g": 1.0 + 0.1 * jax.random.normal(kg1, (C,), jnp.float32),
        "bn1_b": 0.1 * jax.random.normal(kb1, (C,), jnp.float32),
        "bn2_g": 1.0 + 0.1 * jax.random.normal(kg2, (C,), jnp.float32),
        "bn2_b": 0.1 * jax.random.normal(kb2, (C,), jnp.float32),
    }

    out = jax.block_until_ready(jax.jit(basic_block_forward)(x, params))
    ref = jax.block_until_ready(basic_block_reference(x, params))

    assert out.shape == (N, C, H, W), out.shape
    max_err = float(jnp.max(jnp.abs(out - ref)))
    assert jnp.allclose(out, ref, atol=1e-4, rtol=1e-4), max_err

    print("KERNEL_OK")
</pallas_src>

<mosaic_0001>
module attributes {stable_mosaic.version = 11 : i64} {
  func.func @kernel(%arg0: memref<2x16x128xf32, #tpu.memory_space<any>>, %arg1: memref<3x128x128xf32, #tpu.memory_space<vmem>>, %arg2: memref<3x128x128xf32, #tpu.memory_space<vmem>>, %arg3: memref<1x8xf32, #tpu.memory_space<vmem>>, %arg4: memref<1x8xf32, #tpu.memory_space<vmem>>, %arg5: memref<1x8xf32, #tpu.memory_space<vmem>>, %arg6: memref<1x8xf32, #tpu.memory_space<vmem>>, %arg7: memref<128x8xf32, #tpu.memory_space<vmem>>, %arg8: memref<8x128xf32, #tpu.memory_space<vmem>>, %arg9: memref<32x128xf32, #tpu.memory_space<vmem>>, %arg10: memref<2x32x128xf32, #tpu.memory_space<vmem>>, %arg11: memref<2x32x128xf32, #tpu.memory_space<vmem>>, %arg12: memref<!tpu.dma_semaphore, #tpu.memory_space<semaphore_mem>>) attributes {dimension_semantics = [], scalar_prefetch = 0 : i64, scratch_operands = 3 : i64, tpu.core_type = #tpu.core_type<tc>} {
    %c0_i32 = arith.constant 0 : i32
    %c8_i32 = arith.constant 8 : i32
    %c0_i32_0 = arith.constant 0 : i32
    %0 = tpu.memref_slice %arg10[%c0_i32, %c8_i32, %c0_i32_0] : memref<2x32x128xf32, #tpu.memory_space<vmem>> -> memref<2x16x128xf32, #tpu.memory_space<vmem>>
    tpu.enqueue_dma source(%arg0 : memref<2x16x128xf32, #tpu.memory_space<any>>) target(%0 : memref<2x16x128xf32, #tpu.memory_space<vmem>>) target_semaphore(%arg12 : memref<!tpu.dma_semaphore, #tpu.memory_space<semaphore_mem>>)
    %cst = arith.constant 0.000000e+00 : f32
    %1 = vector.broadcast %cst : f32 to vector<2x8x128xf32>
    %cst_1 = arith.constant 0.000000e+00 : f32
    %2 = vector.broadcast %cst_1 : f32 to vector<2x8x128xf32>
    %c0 = arith.constant 0 : index
    %c0_2 = arith.constant 0 : index
    %c0_3 = arith.constant 0 : index
    %3 = vector.load %arg10[%c0, %c0_2, %c0_3] : memref<2x32x128xf32, #tpu.memory_space<vmem>>, vector<2x8x128xf32>
    tpu.vector_store %arg10[%c0, %c0_2, %c0_3], %1 {strides = array<i32>} : memref<2x32x128xf32, #tpu.memory_space<vmem>>, vector<2x8x128xf32>,
    %c0_4 = arith.constant 0 : index
    %c24 = arith.constant 24 : index
    %c0_5 = arith.constant 0 : index
    %4 = vector.load %arg10[%c0_4, %c24, %c0_5] : memref<2x32x128xf32, #tpu.memory_space<vmem>>, vector<2x8x128xf32>
    tpu.vector_store %arg10[%c0_4, %c24, %c0_5], %2 {strides = array<i32>} : memref<2x32x128xf32, #tpu.memory_space<vmem>>, vector<2x8x128xf32>,
    %c0_6 = arith.constant 0 : index
    %c0_7 = arith.constant 0 : index
    %c0_8 = arith.constant 0 : index
    %5 = vector.load %arg11[%c0_6, %c0_7, %c0_8] : memref<2x32x128xf32, #tpu.memory_space<vmem>>, vector<2x8x128xf32>
    tpu.vector_store %arg11[%c0_6, %c0_7, %c0_8], %1 {strides = array<i32>} : memref<2x32x128xf32, #tpu.memory_space<vmem>>, vector<2x8x128xf32>,
    %c0_9 = arith.constant 0 : index
    %c24_10 = arith.constant 24 : index
    %c0_11 = arith.constant 0 : index
    %6 = vector.load %arg11[%c0_9, %c24_10, %c0_11] : memref<2x32x128xf32, #tpu.memory_space<vmem>>, vector<2x8x128xf32>
    tpu.vector_store %arg11[%c0_9, %c24_10, %c0_11], %2 {strides = array<i32>} : memref<2x32x128xf32, #tpu.memory_space<vmem>>, vector<2x8x128xf32>,
    %c0_12 = arith.constant 0 : index
    %c0_13 = arith.constant 0 : index
    %7 = vector.load %arg7[%c0_12, %c0_13] : memref<128x8xf32, #tpu.memory_space<vmem>>, vector<128x8xf32>
    %c0_14 = arith.constant 0 : index
    %c0_15 = arith.constant 0 : index
    %8 = vector.load %arg8[%c0_14, %c0_15] : memref<8x128xf32, #tpu.memory_space<vmem>>, vector<8x128xf32>
    %c0_i32_16 = arith.constant 0 : i32
    %c8_i32_17 = arith.constant 8 : i32
    %c0_i32_18 = arith.constant 0 : i32
    %9 = tpu.memref_slice %arg10[%c0_i32_16, %c8_i32_17, %c0_i32_18] : memref<2x32x128xf32, #tpu.memory_space<vmem>> -> memref<2x16x128xf32, #tpu.memory_space<vmem>>
    tpu.wait_dma2 semaphore(%arg12 : memref<!tpu.dma_semaphore, #tpu.memory_space<semaphore_mem>>) src(%arg0 : memref<2x16x128xf32, #tpu.memory_space<any>>) dst(%9 : memref<2x16x128xf32, #tpu.memory_space<vmem>>)
    %c0_19 = arith.constant 0 : index
    %c7 = arith.constant 7 : index
    %c0_20 = arith.constant 0 : index
    %10 = vector.load %arg10[%c0_19, %c7, %c0_20] : memref<2x32x128xf32, #tpu.memory_space<vmem>>, vector<2x16x128xf32>
    %11 = vector.shape_cast %10 : vector<2x16x128xf32> to vector<32x128xf32>
    %c0_21 = arith.constant 0 : index
    %c0_22 = arith.constant 0 : index
    %c0_23 = arith.constant 0 : index
    %12 = vector.load %arg1[%c0_21, %c0_22, %c0_23] : memref<3x128x128xf32, #tpu.memory_space<vmem>>, vector<1x128x128xf32>
    %13 = vector.shape_cast %12 : vector<1x128x128xf32> to vector<128x128xf32>
    %cst_24 = arith.constant dense<0.000000e+00> : vector<32x128xf32>
    %14 = tpu.matmul %11, %13, %cst_24 {dimension_numbers = #tpu.dot_dimension_numbers<[1], [0], [0], [1], [0, 0, 1, 1], [], []>} : vector<32x128xf32>, vector<128x128xf32>, vector<32x128xf32> -> vector<32x128xf32>
    %c0_25 = arith.constant 0 : index
    %c8 = arith.constant 8 : index
    %c0_26 = arith.constant 0 : index
    %15 = vector.load %arg10[%c0_25, %c8, %c0_26] : memref<2x32x128xf32, #tpu.memory_space<vmem>>, vector<2x16x128xf32>
    %16 = vector.shape_cast %15 : vector<2x16x128xf32> to vector<32x128xf32>
    %c1 = arith.constant 1 : index
    %c0_27 = arith.constant 0 : index
    %c0_28 = arith.constant 0 : index
    %17 = vector.load %arg1[%c1, %c0_27, %c0_28] : memref<3x128x128xf32, #tpu.memory_space<vmem>>, vector<1x128x128xf32>
    %18 = vector.shape_cast %17 : vector<1x128x128xf32> to vector<128x128xf32>
    %cst_29 = arith.constant dense<0.000000e+00> : vector<32x128xf32>
    %19 = tpu.matmul %16, %18, %cst_29 {dimension_numbers = #tpu.dot_dimension_numbers<[1], [0], [0], [1], [0, 0, 1, 1], [], []>} : vector<32x128xf32>, vector<128x128xf32>, vector<32x128xf32> -> vector<32x128xf32>
    %20 = arith.addf %14, %19 : vector<32x128xf32>
    %c0_30 = arith.constant 0 : index
    %c9 = arith.constant 9 : index
    %c0_31 = arith.constant 0 : index
    %21 = vector.load %arg10[%c0_30, %c9, %c0_31] : memref<2x32x128xf32, #tpu.memory_space<vmem>>, vector<2x16x128xf32>
    %22 = vector.shape_cast %21 : vector<2x16x128xf32> to vector<32x128xf32>
    %c2 = arith.constant 2 : index
    %c0_32 = arith.constant 0 : index
    %c0_33 = arith.constant 0 : index
    %23 = vector.load %arg1[%c2, %c0_32, %c0_33] : memref<3x128x128xf32, #tpu.memory_space<vmem>>, vector<1x128x128xf32>
    %24 = vector.shape_cast %23 : vector<1x128x128xf32> to vector<128x128xf32>
    %cst_34 = arith.constant dense<0.000000e+00> : vector<32x128xf32>
    %25 = tpu.matmul %22, %24, %cst_34 {dimension_numbers = #tpu.dot_dimension_numbers<[1], [0], [0], [1], [0, 0, 1, 1], [], []>} : vector<32x128xf32>, vector<128x128xf32>, vector<32x128xf32> -> vector<32x128xf32>
    %26 = arith.addf %20, %25 : vector<32x128xf32>
    %c0_35 = arith.constant 0 : index
    %c0_36 = arith.constant 0 : index
    %27 = vector.load %arg3[%c0_35, %c0_36] : memref<1x8xf32, #tpu.memory_space<vmem>>, vector<1x8xf32>
    %c0_37 = arith.constant 0 : index
    %c0_38 = arith.constant 0 : index
    %28 = vector.load %arg4[%c0_37, %c0_38] : memref<1x8xf32, #tpu.memory_space<vmem>>, vector<1x8xf32>
    %cst_39 = arith.constant dense<0.000000e+00> : vector<128xf32>
    %29 = vector.multi_reduction <add>, %26, %cst_39 [0] : vector<32x128xf32> to vector<128xf32>
    %30 = vector.shape_cast %29 : vector<128xf32> to vector<1x128xf32>
    %cst_40 = arith.constant dense<0.000000e+00> : vector<1x8xf32>
    %31 = tpu.matmul %30, %7, %cst_40 {dimension_numbers = #tpu.dot_dimension_numbers<[1], [0], [0], [1], [0, 0, 1, 1], [], []>} : vector<1x128xf32>, vector<128x8xf32>, vector<1x8xf32> -> vector<1x8xf32>
    %cst_41 = arith.constant 0.001953125 : f32
    %32 = vector.broadcast %cst_41 : f32 to vector<1x8xf32>
    %33 = arith.mulf %31, %32 : vector<1x8xf32>
    %cst_42 = arith.constant dense<0.000000e+00> : vector<1x128xf32>
    %34 = tpu.matmul %33, %8, %cst_42 {dimension_numbers = #tpu.dot_dimension_numbers<[1], [0], [0], [1], [0, 0, 1, 1], [], []>} : vector<1x8xf32>, vector<8x128xf32>, vector<1x128xf32> -> vector<1x128xf32>
    %35 = vector.broadcast %34 : vector<1x128xf32> to vector<32x128xf32>
    %36 = arith.subf %26, %35 : vector<32x128xf32>
    %37 = arith.mulf %36, %36 : vector<32x128xf32>
    %cst_43 = arith.constant dense<0.000000e+00> : vector<128xf32>
    %38 = vector.multi_reduction <add>, %37, %cst_43 [0] : vector<32x128xf32> to vector<128xf32>
    %39 = vector.shape_cast %38 : vector<128xf32> to vector<1x128xf32>
    %cst_44 = arith.constant dense<0.000000e+00> : vector<1x8xf32>
    %40 = tpu.matmul %39, %7, %cst_44 {dimension_numbers = #tpu.dot_dimension_numbers<[1], [0], [0], [1], [0, 0, 1, 1], [], []>} : vector<1x128xf32>, vector<128x8xf32>, vector<1x8xf32> -> vector<1x8xf32>
    %cst_45 = arith.constant 0.001953125 : f32
    %41 = vector.broadcast %cst_45 : f32 to vector<1x8xf32>
    %42 = arith.mulf %40, %41 : vector<1x8xf32>
    %cst_46 = arith.constant 9.99999974E-6 : f32
    %43 = vector.broadcast %cst_46 : f32 to vector<1x8xf32>
    %44 = arith.addf %42, %43 : vector<1x8xf32>
    %45 = math.rsqrt %44 : vector<1x8xf32>
    %46 = arith.mulf %27, %45 : vector<1x8xf32>
    %cst_47 = arith.constant dense<0.000000e+00> : vector<1x128xf32>
    %47 = tpu.matmul %46, %8, %cst_47 {dimension_numbers = #tpu.dot_dimension_numbers<[1], [0], [0], [1], [0, 0, 1, 1], [], []>} : vector<1x8xf32>, vector<8x128xf32>, vector<1x128xf32> -> vector<1x128xf32>
    %48 = vector.broadcast %47 : vector<1x128xf32> to vector<32x128xf32>
    %49 = arith.mulf %36, %48 : vector<32x128xf32>
    %cst_48 = arith.constant dense<0.000000e+00> : vector<1x128xf32>
    %50 = tpu.matmul %28, %8, %cst_48 {dimension_numbers = #tpu.dot_dimension_numbers<[1], [0], [0], [1], [0, 0, 1, 1], [], []>} : vector<1x8xf32>, vector<8x128xf32>, vector<1x128xf32> -> vector<1x128xf32>
    %51 = vector.broadcast %50 : vector<1x128xf32> to vector<32x128xf32>
    %52 = arith.addf %49, %51 : vector<32x128xf32>
    %cst_49 = arith.constant 0.000000e+00 : f32
    %53 = vector.broadcast %cst_49 : f32 to vector<32x128xf32>
    %54 = arith.maximumf %52, %53 : vector<32x128xf32>
    %55 = vector.shape_cast %54 : vector<32x128xf32> to vector<2x16x128xf32>
    %c0_50 = arith.constant 0 : index
    %c8_51 = arith.constant 8 : index
    %c0_52 = arith.constant 0 : index
    %56 = vector.load %arg11[%c0_50, %c8_51, %c0_52] : memref<2x32x128xf32, #tpu.memory_space<vmem>>, vector<2x16x128xf32>
    tpu.vector_store %arg11[%c0_50, %c8_51, %c0_52], %55 {strides = array<i32>} : memref<2x32x128xf32, #tpu.memory_space<vmem>>, vector<2x16x128xf32>,
    %c0_53 = arith.constant 0 : index
    %c7_54 = arith.constant 7 : index
    %c0_55 = arith.constant 0 : index
    %57 = vector.load %arg11[%c0_53, %c7_54, %c0_55] : memref<2x32x128xf32, #tpu.memory_space<vmem>>, vector<2x16x128xf32>
    %58 = vector.shape_cast %57 : vector<2x16x128xf32> to vector<32x128xf32>
    %c0_56 = arith.constant 0 : index
    %c0_57 = arith.constant 0 : index
    %c0_58 = arith.constant 0 : index
    %59 = vector.load %arg2[%c0_56, %c0_57, %c0_58] : memref<3x128x128xf32, #tpu.memory_space<vmem>>, vector<1x128x128xf32>
    %60 = vector.shape_cast %59 : vector<1x128x128xf32> to vector<128x128xf32>
    %cst_59 = arith.constant dense<0.000000e+00> : vector<32x128xf32>
    %61 = tpu.matmul %58, %60, %cst_59 {dimension_numbers = #tpu.dot_dimension_numbers<[1], [0], [0], [1], [0, 0, 1, 1], [], []>} : vector<32x128xf32>, vector<128x128xf32>, vector<32x128xf32> -> vector<32x128xf32>
    %c0_60 = arith.constant 0 : index
    %c8_61 = arith.constant 8 : index
    %c0_62 = arith.constant 0 : index
    %62 = vector.load %arg11[%c0_60, %c8_61, %c0_62] : memref<2x32x128xf32, #tpu.memory_space<vmem>>, vector<2x16x128xf32>
    %63 = vector.shape_cast %62 : vector<2x16x128xf32> to vector<32x128xf32>
    %c1_63 = arith.constant 1 : index
    %c0_64 = arith.constant 0 : index
    %c0_65 = arith.constant 0 : index
    %64 = vector.load %arg2[%c1_63, %c0_64, %c0_65] : memref<3x128x128xf32, #tpu.memory_space<vmem>>, vector<1x128x128xf32>
    %65 = vector.shape_cast %64 : vector<1x128x128xf32> to vector<128x128xf32>
    %cst_66 = arith.constant dense<0.000000e+00> : vector<32x128xf32>
    %66 = tpu.matmul %63, %65, %cst_66 {dimension_numbers = #tpu.dot_dimension_numbers<[1], [0], [0], [1], [0, 0, 1, 1], [], []>} : vector<32x128xf32>, vector<128x128xf32>, vector<32x128xf32> -> vector<32x128xf32>
    %67 = arith.addf %61, %66 : vector<32x128xf32>
    %c0_67 = arith.constant 0 : index
    %c9_68 = arith.constant 9 : index
    %c0_69 = arith.constant 0 : index
    %68 = vector.load %arg11[%c0_67, %c9_68, %c0_69] : memref<2x32x128xf32, #tpu.memory_space<vmem>>, vector<2x16x128xf32>
    %69 = vector.shape_cast %68 : vector<2x16x128xf32> to vector<32x128xf32>
    %c2_70 = arith.constant 2 : index
    %c0_71 = arith.constant 0 : index
    %c0_72 = arith.constant 0 : index
    %70 = vector.load %arg2[%c2_70, %c0_71, %c0_72] : memref<3x128x128xf32, #tpu.memory_space<vmem>>, vector<1x128x128xf32>
    %71 = vector.shape_cast %70 : vector<1x128x128xf32> to vector<128x128xf32>
    %cst_73 = arith.constant dense<0.000000e+00> : vector<32x128xf32>
    %72 = tpu.matmul %69, %71, %cst_73 {dimension_numbers = #tpu.dot_dimension_numbers<[1], [0], [0], [1], [0, 0, 1, 1], [], []>} : vector<32x128xf32>, vector<128x128xf32>, vector<32x128xf32> -> vector<32x128xf32>
    %73 = arith.addf %67, %72 : vector<32x128xf32>
    %c0_74 = arith.constant 0 : index
    %c0_75 = arith.constant 0 : index
    %74 = vector.load %arg5[%c0_74, %c0_75] : memref<1x8xf32, #tpu.memory_space<vmem>>, vector<1x8xf32>
    %c0_76 = arith.constant 0 : index
    %c0_77 = arith.constant 0 : index
    %75 = vector.load %arg6[%c0_76, %c0_77] : memref<1x8xf32, #tpu.memory_space<vmem>>, vector<1x8xf32>
    %cst_78 = arith.constant dense<0.000000e+00> : vector<128xf32>
    %76 = vector.multi_reduction <add>, %73, %cst_78 [0] : vector<32x128xf32> to vector<128xf32>
    %77 = vector.shape_cast %76 : vector<128xf32> to vector<1x128xf32>
    %cst_79 = arith.constant dense<0.000000e+00> : vector<1x8xf32>
    %78 = tpu.matmul %77, %7, %cst_79 {dimension_numbers = #tpu.dot_dimension_numbers<[1], [0], [0], [1], [0, 0, 1, 1], [], []>} : vector<1x128xf32>, vector<128x8xf32>, vector<1x8xf32> -> vector<1x8xf32>
    %cst_80 = arith.constant 0.001953125 : f32
    %79 = vector.broadcast %cst_80 : f32 to vector<1x8xf32>
    %80 = arith.mulf %78, %79 : vector<1x8xf32>
    %cst_81 = arith.constant dense<0.000000e+00> : vector<1x128xf32>
    %81 = tpu.matmul %80, %8, %cst_81 {dimension_numbers = #tpu.dot_dimension_numbers<[1], [0], [0], [1], [0, 0, 1, 1], [], []>} : vector<1x8xf32>, vector<8x128xf32>, vector<1x128xf32> -> vector<1x128xf32>
    %82 = vector.broadcast %81 : vector<1x128xf32> to vector<32x128xf32>
    %83 = arith.subf %73, %82 : vector<32x128xf32>
    %84 = arith.mulf %83, %83 : vector<32x128xf32>
    %cst_82 = arith.constant dense<0.000000e+00> : vector<128xf32>
    %85 = vector.multi_reduction <add>, %84, %cst_82 [0] : vector<32x128xf32> to vector<128xf32>
    %86 = vector.shape_cast %85 : vector<128xf32> to vector<1x128xf32>
    %cst_83 = arith.constant dense<0.000000e+00> : vector<1x8xf32>
    %87 = tpu.matmul %86, %7, %cst_83 {dimension_numbers = #tpu.dot_dimension_numbers<[1], [0], [0], [1], [0, 0, 1, 1], [], []>} : vector<1x128xf32>, vector<128x8xf32>, vector<1x8xf32> -> vector<1x8xf32>
    %cst_84 = arith.constant 0.001953125 : f32
    %88 = vector.broadcast %cst_84 : f32 to vector<1x8xf32>
    %89 = arith.mulf %87, %88 : vector<1x8xf32>
    %cst_85 = arith.constant 9.99999974E-6 : f32
    %90 = vector.broadcast %cst_85 : f32 to vector<1x8xf32>
    %91 = arith.addf %89, %90 : vector<1x8xf32>
    %92 = math.rsqrt %91 : vector<1x8xf32>
    %93 = arith.mulf %74, %92 : vector<1x8xf32>
    %cst_86 = arith.constant dense<0.000000e+00> : vector<1x128xf32>
    %94 = tpu.matmul %93, %8, %cst_86 {dimension_numbers = #tpu.dot_dimension_numbers<[1], [0], [0], [1], [0, 0, 1, 1], [], []>} : vector<1x8xf32>, vector<8x128xf32>, vector<1x128xf32> -> vector<1x128xf32>
    %95 = vector.broadcast %94 : vector<1x128xf32> to vector<32x128xf32>
    %96 = arith.mulf %83, %95 : vector<32x128xf32>
    %cst_87 = arith.constant dense<0.000000e+00> : vector<1x128xf32>
    %97 = tpu.matmul %75, %8, %cst_87 {dimension_numbers = #tpu.dot_dimension_numbers<[1], [0], [0], [1], [0, 0, 1, 1], [], []>} : vector<1x8xf32>, vector<8x128xf32>, vector<1x128xf32> -> vector<1x128xf32>
    %98 = vector.broadcast %97 : vector<1x128xf32> to vector<32x128xf32>
    %99 = arith.addf %96, %98 : vector<32x128xf32>
    %c0_88 = arith.constant 0 : index
    %c8_89 = arith.constant 8 : index
    %c0_90 = arith.constant 0 : index
    %100 = vector.load %arg10[%c0_88, %c8_89, %c0_90] : memref<2x32x128xf32, #tpu.memory_space<vmem>>, vector<2x16x128xf32>
    %101 = vector.shape_cast %100 : vector<2x16x128xf32> to vector<32x128xf32>
    %102 = arith.addf %99, %101 : vector<32x128xf32>
    %cst_91 = arith.constant 0.000000e+00 : f32
    %103 = vector.broadcast %cst_91 : f32 to vector<32x128xf32>
    %104 = arith.maximumf %102, %103 : vector<32x128xf32>
    %c0_92 = arith.constant 0 : index
    %c0_93 = arith.constant 0 : index
    %105 = vector.load %arg9[%c0_92, %c0_93] : memref<32x128xf32, #tpu.memory_space<vmem>>, vector<32x128xf32>
    tpu.vector_store %arg9[%c0_92, %c0_93], %104 {strides = array<i32>} : memref<32x128xf32, #tpu.memory_space<vmem>>, vector<32x128xf32>,
    return
  }
}

</mosaic_0001>

<bundles_post_ra>
// kernel: tile.19
= control target key start
LH: loop header
LB: loop body
LE: loop exit
PB: predicated region body
PF: predicated region fallthrough
CT: control target
= control target key end

     0   :  { %vm6_vm0 = vcmask 1043458   ;;  %vm10_vm1 = vcmask 1045508   ;;  %vm14_vm2 = vcmask 1047558   ;;  %s19_s6 = smov 3  ;;  %s22_s7 = smov 12  ;;  %vm16_vm3 = vcmask 64512   ;;  %s736_s0 = inlined_call_operand.vmem [shape: f32[8,16,8], index: 0, kind: input, shape index: {}]   ;;  %s737_s1 = inlined_call_operand.vmem [shape: f32[8,128], index: 1, kind: output, shape index: {}]  }
   0x1   :  { %v348_v0 = vld [vmem:[%s736_s0 + $0xf] ss:$16 sm:%s19_s6]   ;;  %s27_s12 = smov 48  ;;  %s32_s13 = smov 192  ;;  %vm38_vm4 = vcmask 1048512   ;;  %vm60_vm5 = vcmask 982912  }
   0x2   :  { %v349_v1 = vld [vmem:[%s736_s0 + $0xf] ss:$16 sm:%s22_s7]   ;;  %s63_s18 = smov 3  ;;  %s66_s21 = smov 12  ;;  %vm82_vm6 = vcmask 917312   ;;  %vm104_vm7 = vcmask 851712  }
   0x3   :  { %v25_v2 = vsel %vm6_vm0, %v349_v1, %v348_v0  ;;  %v350_v3 = vld [vmem:[%s736_s0 + $0xf] ss:$16 sm:%s27_s12]   ;;  %v356_v6 = vld [vmem:[%s736_s0 + $0xd] ss:$16 sm:%s63_s18]   ;;  %s71_s22 = smov 48  ;;  %s76_s27 = smov 192 }
   0x4   :  { %v351_v4 = vld [vmem:[%s736_s0 + $0xf] ss:$16 sm:%s32_s13]   ;;  %v30_v5 = vsel %vm10_vm1, %v350_v3, %v25_v2  ;;  %v357_v8 = vld [vmem:[%s736_s0 + $0xd] ss:$16 sm:%s66_s21]   ;;  %s423_s28 = smov 120   ;;  %s41_s2 = smov 3 }
   0x5   :  { %v35_v7 = vsel %vm14_vm2, %v351_v4, %v30_v5  ;;  %v358_v9 = vld [vmem:[%s736_s0 + $0xd] ss:$16 sm:%s71_s22]   ;;  %v69_v10 = vsel %vm6_vm0, %v357_v8, %v356_v6  ;;  %s44_s3 = smov 12  ;;  %v352_v13 = vld [vmem:[%s736_s0 + $0xe] ss:$16 sm:%s41_s2]   ;;  %s49_s8 = smov 48 }
   0x6   :  { %36 = vrot.lane.b32.xlu0 %v35_v7, %s423_s28  ;;  %v359_v11 = vld [vmem:[%s736_s0 + $0xd] ss:$16 sm:%s76_s27]   ;;  %v74_v12 = vsel %vm10_vm1, %v358_v9, %v69_v10  ;;  %s54_s9 = smov 192  ;;  %s85_s14 = smov 3  ;;  %vm126_vm8 = vcmask 786112   ;;  %vm148_vm9 = vcmask 720512  }
   0x7   :  { %v353_v14 = vld [vmem:[%s736_s0 + $0xe] ss:$16 sm:%s44_s3]   ;;  %v79_v15 = vsel %vm14_vm2, %v359_v11, %v74_v12  ;;  %s424_s15 = smov 104   ;;  %v360_v20 = vld [vmem:[%s736_s0 + $0xc] ss:$16 sm:%s85_s14]   ;;  %s88_s18 = smov 12 }
   0x8   :  { %v47_v16 = vsel %vm6_vm0, %v353_v14, %v352_v13  ;;  %v354_v17 = vld [vmem:[%s736_s0 + $0xe] ss:$16 sm:%s49_s8]   ;;  %80 = vrot.lane.b32.xlu1 %v79_v15, %s424_s15  ;;  %s93_s19 = smov 48  ;;  %s98_s24 = smov 192  ;;  %vm170_vm10 = vcmask 654912   ;;  %vm192_vm11 = vcmask 589312  }
   0x9   :  { %v355_v18 = vld [vmem:[%s736_s0 + $0xe] ss:$16 sm:%s54_s9]   ;;  %v52_v19 = vsel %vm10_vm1, %v354_v17, %v47_v16  ;;  %v361_v21 = vld [vmem:[%s736_s0 + $0xc] ss:$16 sm:%s88_s18]   ;;  %s151_s27 = smov 3  ;;  %s154_s28 = smov 12 }
   0xa   :  { %v362_v22 = vld [vmem:[%s736_s0 + $0xc] ss:$16 sm:%s93_s19]   ;;  %v57_v23 = vsel %vm14_vm2, %v355_v18, %v52_v19  ;;  %v91_v24 = vsel %vm6_vm0, %v361_v21, %v360_v20  ;;  %v372_v27 = vld [vmem:[%s736_s0 + $0x9] ss:$16 sm:%s151_s27]   ;;  %s159_s4 = smov 48  ;;  %s164_s7 = smov 192 }
   0xb   :  { %v363_v25 = vld [vmem:[%s736_s0 + $0xc] ss:$16 sm:%s98_s24]   ;;  %v96_v26 = vsel %vm10_vm1, %v362_v22, %v91_v24  ;;  %v373_v28 = vld [vmem:[%s736_s0 + $0x9] ss:$16 sm:%s154_s28]   ;;  %s173_s8 = smov 3  ;;  %s425_s9 = smov 112  }
   0xc   :  { %v157_v29 = vsel %vm6_vm0, %v373_v28, %v372_v27  ;;  %v374_v30 = vld [vmem:[%s736_s0 + $0x9] ss:$16 sm:%s159_s4]   ;;  %v101_v31 = vsel %vm14_vm2, %v363_v25, %v96_v26  ;;  %v376_v32 = vld [vmem:[%s736_s0 + $0x8] ss:$16 sm:%s173_s8]   ;;  %s176_s12 = smov 12  ;;  %s181_s13 = smov 48 }
   0xd   :  { %v377_v33 = vld [vmem:[%s736_s0 + $0x8] ss:$16 sm:%s176_s12]   ;;  %s186_s16 = smov 192  ;;  %v162_v34 = vsel %vm10_vm1, %v374_v30, %v157_v29  ;;  %v375_v35 = vld [vmem:[%s736_s0 + $0x9] ss:$16 sm:%s164_s7]   ;;  %s217_s21 = smov 3 }
   0xe   :  { %58 = vrot.lane.b32.xlu0 %v57_v23, %s425_s9  ;;  %v179_v36 = vsel %vm6_vm0, %v377_v33, %v376_v32  ;;  %v378_v37 = vld [vmem:[%s736_s0 + $0x8] ss:$16 sm:%s181_s13]   ;;  %s220_s22 = smov 12  ;;  %s426_s23 = smov 96   ;;  %v167_v40 = vsel %vm14_vm2, %v375_v35, %v162_v34  ;;  %vm214_vm12 = vcmask 523712   ;;  %vm236_vm13 = vcmask 458112  }
   0xf   :  { %s225_s24 = smov 48  ;;  %v384_v38 = vld [vmem:[%s736_s0 + $0x6] ss:$16 sm:%s217_s21]   ;;  %s239_s29 = smov 3  ;;  %v184_v41 = vsel %vm10_vm1, %v378_v37, %v179_v36  ;;  %v379_v42 = vld [vmem:[%s736_s0 + $0x8] ss:$16 sm:%s186_s16]  }
  0x10   :  { %102 = vrot.lane.b32.xlu1 %v101_v31, %s426_s23  ;;  %v385_v39 = vld [vmem:[%s736_s0 + $0x6] ss:$16 sm:%s220_s22]   ;;  %s230_s3 = smov 192  ;;  %s242_s4 = smov 12  ;;  %v189_v47 = vsel %vm14_vm2, %v379_v42, %v184_v41  ;;  %vm258_vm14 = vcmask 392512   ;;  %vm280_vm15 = vcmask 326912  }
  0x11   :  { %v386_v43 = vld [vmem:[%s736_s0 + $0x6] ss:$16 sm:%s225_s24]   ;;  %s247_s7 = smov 48  ;;  %v223_v44 = vsel %vm6_vm0, %v385_v39, %v384_v38  ;;  %v388_v45 = vld [vmem:[%s736_s0 + $0x5] ss:$16 sm:%s239_s29]   ;;  %s107_s12 = smov 3 }
  0x12   :  { %v389_v46 = vld [vmem:[%s736_s0 + $0x5] ss:$16 sm:%s242_s4]   ;;  %s110_s13 = smov 12  ;;  %s427_s14 = smov 72   ;;  %v387_v48 = vld [vmem:[%s736_s0 + $0x6] ss:$16 sm:%s230_s3]   ;;  %v228_v52 = vsel %vm10_vm1, %v386_v43, %v223_v44 }
  0x13   :  { %v364_v49 = vld [vmem:[%s736_s0 + $0xb] ss:$16 sm:%s107_s12]   ;;  %s115_s19 = smov 48  ;;  %s120_s20 = smov 192  ;;  %v245_v53 = vsel %vm6_vm0, %v389_v46, %v388_v45  ;;  %v390_v54 = vld [vmem:[%s736_s0 + $0x5] ss:$16 sm:%s247_s7]   ;;  %v233_v61 = vsel %vm14_vm2, %v387_v48, %v228_v52 }
  0x14   :  { %s252_s21 = smov 192  ;;  %v365_v50 = vld [vmem:[%s736_s0 + $0xb] ss:$16 sm:%s110_s13]   ;;  %s283_s26 = smov 3  ;;  %v250_v62 = vsel %vm10_vm1, %v390_v54, %v245_v53 }
  0x15   :  { %v366_v51 = vld [vmem:[%s736_s0 + $0xb] ss:$16 sm:%s115_s19]   ;;  %v113_v55 = vsel %vm6_vm0, %v365_v50, %v364_v49  ;;  %s286_s2 = smov 12  ;;  %s428_s3 = smov 64   ;;  %v396_v59 = vld [vmem:[%s736_s0 + $0x3] ss:$16 sm:%s283_s26]  }
  0x16   :  { %168 = vrot.lane.b32.xlu0 %v167_v40, %s427_s14  ;;  %v367_v56 = vld [vmem:[%s736_s0 + $0xb] ss:$16 sm:%s120_s20]   ;;  %v118_v57 = vsel %vm10_vm1, %v366_v51, %v113_v55  ;;  %s291_s4 = smov 48  ;;  %s305_s9 = smov 3 }
  0x17   :  { %v123_v58 = vsel %vm14_vm2, %v367_v56, %v118_v57  ;;  %v397_v60 = vld [vmem:[%s736_s0 + $0x3] ss:$16 sm:%s286_s2]   ;;  %s308_s10 = smov 12  ;;  %v391_v63 = vld [vmem:[%s736_s0 + $0x5] ss:$16 sm:%s252_s21]   ;;  %s429_s13 = smov 88  }
  0x18   :  { %190 = vrot.lane.b32.xlu1 %v189_v47, %s428_s3  ;;  %124 = vrot.lane.b32.xlu2 %v123_v58, %s429_s13  ;;  %s296_s14 = smov 192  ;;  %s313_s15 = smov 48  ;;  %v398_v0 = vld [vmem:[%s736_s0 + $0x3] ss:$16 sm:%s291_s4]   ;;  %v289_v2 = vsel %vm6_vm0, %v397_v60, %v396_v59  ;;  %v255_v5 = vsel %vm14_vm2, %v391_v63, %v250_v62 }
  0x19   :  { %v400_v1 = vld [vmem:[%s736_s0 + $0x2] ss:$16 sm:%s305_s9]   ;;  %s129_s20 = smov 3  ;;  %s132_s25 = smov 12  ;;  %v399_v6 = vld [vmem:[%s736_s0 + $0x3] ss:$16 sm:%s296_s14]   ;;  %v294_v12 = vsel %vm10_vm1, %v398_v0, %v289_v2 }
  0x1a   :  { %v401_v3 = vld [vmem:[%s736_s0 + $0x2] ss:$16 sm:%s308_s10]   ;;  %v368_v4 = vld [vmem:[%s736_s0 + $0xa] ss:$16 sm:%s129_s20]   ;;  %s137_s26 = smov 48  ;;  %s430_s27 = smov 48   ;;  %v299_v20 = vsel %vm14_vm2, %v399_v6, %v294_v12 }
  0x1b   :  { %v402_v7 = vld [vmem:[%s736_s0 + $0x2] ss:$16 sm:%s313_s15]   ;;  %s318_s3 = smov 192  ;;  %v369_v8 = vld [vmem:[%s736_s0 + $0xa] ss:$16 sm:%s132_s25]   ;;  %s142_s6 = smov 192  ;;  %v311_v13 = vsel %vm6_vm0, %v401_v3, %v400_v1 }
  0x1c   :  { %v135_v9 = vsel %vm6_vm0, %v369_v8, %v368_v4  ;;  %v370_v10 = vld [vmem:[%s736_s0 + $0xa] ss:$16 sm:%s137_s26]   ;;  %s195_s11 = smov 3  ;;  %s198_s12 = smov 12  ;;  %v316_v21 = vsel %vm10_vm1, %v402_v7, %v311_v13  ;;  %v403_v22 = vld [vmem:[%s736_s0 + $0x2] ss:$16 sm:%s318_s3]  }
  0x1d   :  { %v371_v11 = vld [vmem:[%s736_s0 + $0xa] ss:$16 sm:%s142_s6]   ;;  %v140_v14 = vsel %vm10_vm1, %v370_v10, %v135_v9  ;;  %v380_v15 = vld [vmem:[%s736_s0 + $0x7] ss:$16 sm:%s195_s11]   ;;  %s203_s17 = smov 48  ;;  %s431_s18 = smov 40   ;;  %v321_v25 = vsel %vm14_vm2, %v403_v22, %v316_v21 }
  0x1e   :  { %234 = vrot.lane.b32.xlu0 %v233_v61, %s430_s27  ;;  %v381_v16 = vld [vmem:[%s736_s0 + $0x7] ss:$16 sm:%s198_s12]   ;;  %v145_v17 = vsel %vm14_vm2, %v371_v11, %v140_v14  ;;  %s208_s21 = smov 192  ;;  %s432_s24 = smov 80  }
  0x1f   :  { %v201_v18 = vsel %vm6_vm0, %v381_v16, %v380_v15  ;;  %v382_v19 = vld [vmem:[%s736_s0 + $0x7] ss:$16 sm:%s203_s17]   ;;  %s261_s25 = smov 3  ;;  %s264_s26 = smov 12 }
  0x20   :  { %256 = vrot.lane.b32.xlu1 %v255_v5, %s431_s18  ;;  %146 = vrot.lane.b32.xlu2 %v145_v17, %s432_s24  ;;  %v206_v23 = vsel %vm10_vm1, %v382_v19, %v201_v18  ;;  %v383_v24 = vld [vmem:[%s736_s0 + $0x7] ss:$16 sm:%s208_s21]   ;;  %s433_s29 = smov 24   ;;  %s269_s5 = smov 48 }
  0x21   :  { %v392_v26 = vld [vmem:[%s736_s0 + $0x4] ss:$16 sm:%s261_s25]   ;;  %v211_v28 = vsel %vm14_vm2, %v383_v24, %v206_v23  ;;  %s434_s6 = smov 16   ;;  %s274_s9 = smov 192 }
  0x22   :  { %v393_v27 = vld [vmem:[%s736_s0 + $0x4] ss:$16 sm:%s264_s26]   ;;  %s435_s10 = smov 56   ;;  %s327_s11 = smov 3 }
  0x23   :  { %v267_v29 = vsel %vm6_vm0, %v393_v27, %v392_v26  ;;  %v394_v30 = vld [vmem:[%s736_s0 + $0x4] ss:$16 sm:%s269_s5]   ;;  %s330_s12 = smov 12  ;;  %v404_v33 = vld [vmem:[%s736_s0 + $0x1] ss:$16 sm:%s327_s11]   ;;  %s335_s19 = smov 48 }
  0x24   :  { %v272_v31 = vsel %vm10_vm1, %v394_v30, %v267_v29  ;;  %v395_v32 = vld [vmem:[%s736_s0 + $0x4] ss:$16 sm:%s274_s9]   ;;  %v405_v34 = vld [vmem:[%s736_s0 + $0x1] ss:$16 sm:%s330_s12]   ;;  %s340_s22 = smov 192  ;;  %s436_s23 = smov 32  }
  0x25   :  { %v277_v35 = vsel %vm14_vm2, %v395_v32, %v272_v31  ;;  %v333_v36 = vsel %vm6_vm0, %v405_v34, %v404_v33  ;;  %v406_v37 = vld [vmem:[%s736_s0 + $0x1] ss:$16 sm:%s335_s19]   ;;  %s437_s26 = smov 8   ;;  %s2_s27 = smov 3 }
  0x26   :  { %300 = vrot.lane.b32.xlu0 %v299_v20, %s433_s29  ;;  %v338_v38 = vsel %vm10_vm1, %v406_v37, %v333_v36  ;;  %v407_v39 = vld [vmem:[%s736_s0 + $0x1] ss:$16 sm:%s340_s22]   ;;  %s4_s28 = smov 12  ;;  %s8_s29 = smov 48 }
  0x27   :  { %v343_v40 = vsel %vm14_vm2, %v407_v39, %v338_v38  ;;  %s12_s30 = smov 192  ;;  %v3_v41 = vld [vmem:[%s736_s0] ss:$16 sm:%s2_s27]  }
  0x28   :  { %322 = vrot.lane.b32.xlu1 %v321_v25, %s434_s6  ;;  %212 = vrot.lane.b32.xlu2 %v211_v28, %s435_s10  ;;  %v5_v42 = vld [vmem:[%s736_s0] ss:$16 sm:%s4_s28]  }
  0x29   :  { %v7_v43 = vsel %vm6_vm0, %v5_v42, %v3_v41  ;;  %v9_v44 = vld [vmem:[%s736_s0] ss:$16 sm:%s8_s29]   ;;  %vm302_vm0 = vcmask 261312  }
  0x2a   :  { %v11_v45 = vsel %vm10_vm1, %v9_v44, %v7_v43  ;;  %v13_v46 = vld [vmem:[%s736_s0] ss:$16 sm:%s12_s30]   ;;  %vm324_vm1 = vcmask 195712  }
  0x2b   :  { %v15_v47 = vsel %vm14_vm2, %v13_v46, %v11_v45  ;;  %vm346_vm2 = vcmask 130112  }
  0x2c   :  { %17 = vst.msk [vmem:[%s737_s1] sm:$0xff] %vm16_vm3, %v15_v47  }
  0x30   :  { %278 = vrot.lane.b32.xlu2 %v277_v35, %s436_s23 }
  0x38   :  { %344 = vrot.lane.b32.xlu2 %v343_v40, %s437_s26 }
  0x72   :  { %v125_v48 = vpop.permute.xlu2 %124  }
  0x78   :  { %v37_v49 = vpop.permute.xlu0 %36  }
  0x79   :  { %39 = vst.msk [vmem:[%s737_s1] sm:$0xff] %vm38_vm4, %v37_v49  }
  0x7a   :  { %v81_v50 = vpop.permute.xlu1 %80   ;;  %v147_v51 = vpop.permute.xlu2 %146  }
  0x80   :  { %v59_v52 = vpop.permute.xlu0 %58  }
  0x81   :  { %61 = vst.msk [vmem:[%s737_s1] sm:$0xff] %vm60_vm5, %v59_v52  }
  0x82   :  { %83 = vst.msk [vmem:[%s737_s1] sm:$0xff] %vm82_vm6, %v81_v50   ;;  %v103_v53 = vpop.permute.xlu1 %102   ;;  %v213_v54 = vpop.permute.xlu2 %212  }
  0x83   :  { %105 = vst.msk [vmem:[%s737_s1] sm:$0xff] %vm104_vm7, %v103_v53  }
  0x84   :  { %127 = vst.msk [vmem:[%s737_s1] sm:$0xff] %vm126_vm8, %v125_v48  }
  0x85   :  { %149 = vst.msk [vmem:[%s737_s1] sm:$0xff] %vm148_vm9, %v147_v51  }
  0x88   :  { %v169_v55 = vpop.permute.xlu0 %168  }
  0x89   :  { %171 = vst.msk [vmem:[%s737_s1] sm:$0xff] %vm170_vm10, %v169_v55  }
  0x8a   :  { %v191_v56 = vpop.permute.xlu1 %190   ;;  %v279_v57 = vpop.permute.xlu2 %278  }
  0x8b   :  { %193 = vst.msk [vmem:[%s737_s1] sm:$0xff] %vm192_vm11, %v191_v56  }
  0x8c   :  { %215 = vst.msk [vmem:[%s737_s1] sm:$0xff] %vm214_vm12, %v213_v54  }
  0x90   :  { %v235_v58 = vpop.permute.xlu0 %234  }
  0x91   :  { %237 = vst.msk [vmem:[%s737_s1] sm:$0xff] %vm236_vm13, %v235_v58  }
  0x92   :  { %v257_v59 = vpop.permute.xlu1 %256   ;;  %v345_v60 = vpop.permute.xlu2 %344  }
  0x93   :  { %259 = vst.msk [vmem:[%s737_s1] sm:$0xff] %vm258_vm14, %v257_v59  }
  0x94   :  { %281 = vst.msk [vmem:[%s737_s1] sm:$0xff] %vm280_vm15, %v279_v57  }
  0x98   :  { %v301_v61 = vpop.permute.xlu0 %300  }
  0x99   :  { %303 = vst.msk [vmem:[%s737_s1] sm:$0xff] %vm302_vm0, %v301_v61  }
  0x9a   :  { %v323_v62 = vpop.permute.xlu1 %322  }
  0x9b   :  { %325 = vst.msk [vmem:[%s737_s1] sm:$0xff] %vm324_vm1, %v323_v62  }
  0x9c   :  { %347 = vst.msk [vmem:[%s737_s1] sm:$0xff] %vm346_vm2, %v345_v60  }

// kernel: basic_block_forward.1
= control target key start
LH: loop header
LB: loop body
LE: loop exit
PB: predicated region body
PF: predicated region fallthrough
CT: control target
= control target key end

     0   :  { %s1403_s0 = inlined_call_operand.vmem [shape: f32[2,16,128], index: 0, kind: input, shape index: {}]   ;;  %s1404_s1 = inlined_call_operand.vmem [shape: f32[3,128,128], index: 1, kind: input, shape index: {}]   ;;  %s1405_s2 = inlined_call_operand.vmem [shape: f32[3,128,128], index: 2, kind: input, shape index: {}]   ;;  %s1406_s3 = inlined_call_operand.vmem [shape: f32[1,8], index: 3, kind: input, shape index: {}]   ;;  %s1407_s4 = inlined_call_operand.vmem [shape: f32[1,8], index: 4, kind: input, shape index: {}]   ;;  %s1408_s5 = inlined_call_operand.vmem [shape: f32[1,8], index: 5, kind: input, shape index: {}]   ;;  %s1409_s6 = inlined_call_operand.vmem [shape: f32[1,8], index: 6, kind: input, shape index: {}]   ;;  %s1410_s7 = inlined_call_operand.vmem [shape: f32[128,8], index: 7, kind: input, shape index: {}]   ;;  %s1411_s8 = inlined_call_operand.vmem [shape: f32[8,128], index: 8, kind: input, shape index: {}]   ;;  %s1412_s9 = inlined_call_operand.vmem [shape: f32[32,128], index: 9, kind: output, shape index: {}]  }
   0x1   :  { %v41_v0 = vld [vmem:[%s1403_s0] sm:$0xff]  ;;  %v43_v1 = vld [vmem:[%s1403_s0 + $0x8] sm:$0xff]  ;;  %v45_v2 = vld [vmem:[%s1403_s0 + $0x10] sm:$0xff] }
   0x2   :  { %42 = vst [vmem:[#allocation2 + $0x8] sm:$0xff] %v41_v0  ;;  %v47_v3 = vld [vmem:[%s1403_s0 + $0x18] sm:$0xff] }
   0x3   :  { %44 = vst [vmem:[#allocation2 + $0x10] sm:$0xff] %v43_v1 }
   0x4   :  { %46 = vst [vmem:[#allocation2 + $0x28] sm:$0xff] %v45_v2 }
   0x5   :  { %48 = vst [vmem:[#allocation2 + $0x30] sm:$0xff] %v47_v3 }
   0x6   :  { %54 = vsyncadd [#allocation4], 512  ;;  %v897_v4 = vld [vmem:[%s1410_s7] sm:$0xff]  ;;  %v902_v5 = vld [vmem:[%s1410_s7 + $0x8] sm:$0xff]  ;;  %v831_v6 = vmov 0.0  }
   0x7   :  { %55 = vst [vmem:[#allocation2] sm:$0xff] %v831_v6  ;;  %v907_v7 = vld [vmem:[%s1410_s7 + $0x10] sm:$0xff]  ;;  %v912_v8 = vld [vmem:[%s1410_s7 + $0x18] sm:$0xff]  ;;  %v917_v9 = vld [vmem:[%s1410_s7 + $0x20] sm:$0xff] }
   0x8   :  { %56 = vst [vmem:[#allocation2 + $0x20] sm:$0xff] %v831_v6  ;;  %v922_v10 = vld [vmem:[%s1410_s7 + $0x28] sm:$0xff]  ;;  %v927_v11 = vld [vmem:[%s1410_s7 + $0x30] sm:$0xff]  ;;  %v932_v12 = vld [vmem:[%s1410_s7 + $0x38] sm:$0xff] }
   0x9   :  { %57 = vst [vmem:[#allocation2 + $0x18] sm:$0xff] %v831_v6  ;;  %v937_v13 = vld [vmem:[%s1410_s7 + $0x40] sm:$0xff]  ;;  %v942_v14 = vld [vmem:[%s1410_s7 + $0x48] sm:$0xff]  ;;  %v947_v15 = vld [vmem:[%s1410_s7 + $0x50] sm:$0xff] }
   0xa   :  { %58 = vst [vmem:[#allocation2 + $0x38] sm:$0xff] %v831_v6  ;;  %v952_v16 = vld [vmem:[%s1410_s7 + $0x58] sm:$0xff]  ;;  %v957_v17 = vld [vmem:[%s1410_s7 + $0x60] sm:$0xff]  ;;  %v962_v18 = vld [vmem:[%s1410_s7 + $0x68] sm:$0xff] }
   0xb   :  { %59 = vst [vmem:[#allocation3] sm:$0xff] %v831_v6  ;;  %v967_v19 = vld [vmem:[%s1410_s7 + $0x70] sm:$0xff]  ;;  %v972_v20 = vld [vmem:[%s1410_s7 + $0x78] sm:$0xff]  ;;  %v977_v21 = vld [vmem:[%s1411_s8] sm:$0xff] }
   0xc   :  { %60 = vst [vmem:[#allocation3 + $0x20] sm:$0xff] %v831_v6 }
   0xd   :  { %61 = vst [vmem:[#allocation3 + $0x18] sm:$0xff] %v831_v6 }
   0xe   :  { %62 = vst [vmem:[#allocation3 + $0x38] sm:$0xff] %v831_v6 }
   0xf   :  { %829 = dma.done.wait [#allocation4], 512 }
  0x10   :  { %830 = vsyncadd [#allocation4], 4294966784  ;;  %248 = vmatpush.msra.mxu3 %v972_v20  ;;  %v784_v22 = vld [vmem:[%s1404_s1 + $0x178] sm:$0xff]  ;;  %v783_v23 = vld [vmem:[%s1404_s1 + $0x170] sm:$0xff]  ;;  %vm269_vm0 = vcmask 64512  }
  0x11   :  { %v768_v24 = vld [vmem:[%s1404_s1 + $0xf8] sm:$0xff]  ;;  %204 = vmatpush.msra.mxu2 %v784_v22  ;;  %v767_v26 = vld [vmem:[%s1404_s1 + $0xf0] sm:$0xff]  ;;  %v782_v27 = vld [vmem:[%s1404_s1 + $0x168] sm:$0xff] }
  0x12   :  { %249 = vmatpush.msra.mxu3 %v967_v19  ;;  %125 = vmatpush.msra.mxu0 %v768_v24  ;;  %v103_v25 = vld [vmem:[%s1404_s1 + $0x78] sm:$0xff]  ;;  %v102_v28 = vld [vmem:[%s1404_s1 + $0x70] sm:$0xff]  ;;  %v766_v29 = vld [vmem:[%s1404_s1 + $0xe8] sm:$0xff] }
  0x13   :  { %154 = vmatpush.msra.mxu1 %v103_v25  ;;  %205 = vmatpush.msra.mxu2 %v783_v23  ;;  %v101_v30 = vld [vmem:[%s1404_s1 + $0x68] sm:$0xff]  ;;  %v781_v31 = vld [vmem:[%s1404_s1 + $0x160] sm:$0xff]  ;;  %v780_v34 = vld [vmem:[%s1404_s1 + $0x158] sm:$0xff] }
  0x14   :  { %250 = vmatpush.msra.mxu3 %v962_v18  ;;  %126 = vmatpush.msra.mxu0 %v767_v26  ;;  %v765_v32 = vld [vmem:[%s1404_s1 + $0xe0] sm:$0xff]  ;;  %v764_v35 = vld [vmem:[%s1404_s1 + $0xd8] sm:$0xff]  ;;  %v779_v37 = vld [vmem:[%s1404_s1 + $0x150] sm:$0xff] }
  0x15   :  { %155 = vmatpush.msra.mxu1 %v102_v28  ;;  %206 = vmatpush.msra.mxu2 %v782_v27  ;;  %v100_v33 = vld [vmem:[%s1404_s1 + $0x60] sm:$0xff]  ;;  %v99_v36 = vld [vmem:[%s1404_s1 + $0x58] sm:$0xff]  ;;  %v763_v38 = vld [vmem:[%s1404_s1 + $0xd0] sm:$0xff] }
  0x16   :  { %251 = vmatpush.msra.mxu3 %v957_v17  ;;  %127 = vmatpush.msra.mxu0 %v766_v29  ;;  %v98_v39 = vld [vmem:[%s1404_s1 + $0x50] sm:$0xff]  ;;  %v778_v40 = vld [vmem:[%s1404_s1 + $0x148] sm:$0xff]  ;;  %v777_v43 = vld [vmem:[%s1404_s1 + $0x140] sm:$0xff] }
  0x17   :  { %156 = vmatpush.msra.mxu1 %v101_v30  ;;  %207 = vmatpush.msra.mxu2 %v781_v31  ;;  %v762_v41 = vld [vmem:[%s1404_s1 + $0xc8] sm:$0xff]  ;;  %v761_v44 = vld [vmem:[%s1404_s1 + $0xc0] sm:$0xff]  ;;  %v776_v46 = vld [vmem:[%s1404_s1 + $0x138] sm:$0xff] }
  0x18   :  { %252 = vmatpush.msra.mxu3 %v952_v16  ;;  %128 = vmatpush.msra.mxu0 %v765_v32  ;;  %v97_v42 = vld [vmem:[%s1404_s1 + $0x48] sm:$0xff]  ;;  %v96_v45 = vld [vmem:[%s1404_s1 + $0x40] sm:$0xff]  ;;  %v760_v47 = vld [vmem:[%s1404_s1 + $0xb8] sm:$0xff] }
  0x19   :  { %157 = vmatpush.msra.mxu1 %v100_v33  ;;  %208 = vmatpush.msra.mxu2 %v780_v34  ;;  %v95_v48 = vld [vmem:[%s1404_s1 + $0x38] sm:$0xff]  ;;  %v775_v49 = vld [vmem:[%s1404_s1 + $0x130] sm:$0xff]  ;;  %v774_v52 = vld [vmem:[%s1404_s1 + $0x128] sm:$0xff] }
  0x1a   :  { %253 = vmatpush.msra.mxu3 %v947_v15  ;;  %129 = vmatpush.msra.mxu0 %v764_v35  ;;  %v759_v50 = vld [vmem:[%s1404_s1 + $0xb0] sm:$0xff]  ;;  %v758_v53 = vld [vmem:[%s1404_s1 + $0xa8] sm:$0xff]  ;;  %v773_v55 = vld [vmem:[%s1404_s1 + $0x120] sm:$0xff] }
  0x1b   :  { %158 = vmatpush.msra.mxu1 %v99_v36  ;;  %209 = vmatpush.msra.mxu2 %v779_v37  ;;  %v94_v51 = vld [vmem:[%s1404_s1 + $0x30] sm:$0xff]  ;;  %v93_v54 = vld [vmem:[%s1404_s1 + $0x28] sm:$0xff]  ;;  %v757_v56 = vld [vmem:[%s1404_s1 + $0xa0] sm:$0xff] }
  0x1c   :  { %254 = vmatpush.msra.mxu3 %v942_v14  ;;  %130 = vmatpush.msra.mxu0 %v763_v38  ;;  %v92_v57 = vld [vmem:[%s1404_s1 + $0x20] sm:$0xff]  ;;  %v772_v58 = vld [vmem:[%s1404_s1 + $0x118] sm:$0xff]  ;;  %v771_v61 = vld [vmem:[%s1404_s1 + $0x110] sm:$0xff] }
  0x1d   :  { %159 = vmatpush.msra.mxu1 %v98_v39  ;;  %210 = vmatpush.msra.mxu2 %v778_v40  ;;  %v756_v59 = vld [vmem:[%s1404_s1 + $0x98] sm:$0xff]  ;;  %v755_v62 = vld [vmem:[%s1404_s1 + $0x90] sm:$0xff]  ;;  %v770_v0 = vld [vmem:[%s1404_s1 + $0x108] sm:$0xff] }
  0x1e   :  { %255 = vmatpush.msra.mxu3 %v937_v13  ;;  %131 = vmatpush.msra.mxu0 %v762_v41  ;;  %v91_v60 = vld [vmem:[%s1404_s1 + $0x18] sm:$0xff]  ;;  %v90_v63 = vld [vmem:[%s1404_s1 + $0x10] sm:$0xff]  ;;  %v754_v1 = vld [vmem:[%s1404_s1 + $0x88] sm:$0xff] }
  0x1f   :  { %160 = vmatpush.msra.mxu1 %v97_v42  ;;  %211 = vmatpush.msra.mxu2 %v777_v43  ;;  %v89_v2 = vld [vmem:[%s1404_s1 + $0x8] sm:$0xff]  ;;  %v769_v3 = vld [vmem:[%s1404_s1 + $0x100] sm:$0xff]  ;;  %v184_v26 = vld [vmem:[#allocation2 + $0x11] sm:$0xff] }
  0x20   :  { %256 = vmatpush.msra.mxu3 %v932_v12  ;;  %132 = vmatpush.msra.mxu0 %v761_v44  ;;  %v753_v6 = vld [vmem:[%s1404_s1 + $0x80] sm:$0xff]  ;;  %v183_v22 = vld [vmem:[#allocation2 + $0x9] sm:$0xff]  ;;  %v186_v32 = vld [vmem:[#allocation2 + $0x31] sm:$0xff] }
  0x21   :  { %161 = vmatpush.msra.mxu1 %v96_v45  ;;  %212 = vmatpush.msra.mxu2 %v776_v46  ;;  %v88_v23 = vld [vmem:[%s1404_s1] sm:$0xff]  ;;  %v1140_v24 = vld [vmem:[#allocation2 + $0x8] sm:$0xff]  ;;  %v1145_v27 = vld [vmem:[#allocation2 + $0x10] sm:$0xff] }
  0x22   :  { %257 = vmatpush.msra.mxu3 %v927_v11  ;;  %133 = vmatpush.msra.mxu0 %v760_v47  ;;  %v84_v25 = vld [vmem:[#allocation2 + $0x7] sm:$0xff]  ;;  %v85_v28 = vld [vmem:[#allocation2 + $0xf] sm:$0xff] }
  0x23   :  { %162 = vmatpush.msra.mxu1 %v95_v48  ;;  %213 = vmatpush.msra.mxu2 %v775_v49  ;;  %v185_v29 = vld [vmem:[#allocation2 + $0x29] sm:$0xff] }
  0x24   :  { %258 = vmatpush.msra.mxu3 %v922_v10  ;;  %134 = vmatpush.msra.mxu0 %v759_v50  ;;  %v1152_v30 = vld [vmem:[#allocation2 + $0x28] sm:$0xff]  ;;  %v1159_v33 = vld [vmem:[#allocation2 + $0x30] sm:$0xff] }
  0x25   :  { %163 = vmatpush.msra.mxu1 %v94_v51  ;;  %214 = vmatpush.msra.mxu2 %v774_v52  ;;  %v86_v31 = vld [vmem:[#allocation2 + $0x27] sm:$0xff]  ;;  %v87_v34 = vld [vmem:[#allocation2 + $0x2f] sm:$0xff] }
  0x26   :  { %259 = vmatpush.msra.mxu3 %v917_v9  ;;  %135 = vmatpush.msra.mxu0 %v758_v53 }
  0x27   :  { %164 = vmatpush.msra.mxu1 %v93_v54  ;;  %215 = vmatpush.msra.mxu2 %v773_v55 }
  0x28   :  { %260 = vmatpush.msra.mxu3 %v912_v8  ;;  %136 = vmatpush.msra.mxu0 %v757_v56 }
  0x29   :  { %165 = vmatpush.msra.mxu1 %v92_v57  ;;  %216 = vmatpush.msra.mxu2 %v772_v58 }
  0x2a   :  { %261 = vmatpush.msra.mxu3 %v907_v7  ;;  %137 = vmatpush.msra.mxu0 %v756_v59 }
  0x2b   :  { %166 = vmatpush.msra.mxu1 %v91_v60  ;;  %217 = vmatpush.msra.mxu2 %v771_v61 }
  0x2c   :  { %262 = vmatpush.msra.mxu3 %v902_v5  ;;  %138 = vmatpush.msra.mxu0 %v755_v62 }
  0x2d   :  { %167 = vmatpush.msra.mxu1 %v90_v63  ;;  %218 = vmatpush.msra.mxu2 %v770_v0 }
  0x2e   :  { %263 = vmatpush.msra.mxu3 %v897_v4  ;;  %139 = vmatpush.msra.mxu0 %v754_v1 }
  0x2f   :  { %168 = vmatpush.msra.mxu1 %v89_v2  ;;  %219 = vmatpush.msra.mxu2 %v769_v3 }
  0x30   :  { %288 = vmatpush.msrb.mxu3 %v977_v21  ;;  %140 = vmatpush.msra.mxu0 %v753_v6 }
  0x31   :  { %220 = vmatmul.f32.vlgmr.msra.gmra.mxu2 %v183_v22  ;;  %169 = vmatpush.msra.mxu1 %v88_v23 }
  0x32   :  { %141 = vmatmul.f32.vlgmr.msra.gmra.mxu0 %v1140_v24  ;;  %170 = vmatmul.f32.vlgmr.msra.gmra.mxu1 %v84_v25 }
  0x33   :  { %311 = vmatpush.msrb.mxu0 %v972_v20 }
  0x35   :  { %312 = vmatpush.msrb.mxu0 %v967_v19 }
  0x37   :  { %313 = vmatpush.msrb.mxu0 %v962_v18 }
  0x39   :  { %223 = vmatmul.f32.gmra.mxu2 %v184_v26  ;;  %314 = vmatpush.msrb.mxu0 %v957_v17 }
  0x3a   :  { %144 = vmatmul.f32.gmra.mxu0 %v1145_v27  ;;  %173 = vmatmul.f32.gmra.mxu1 %v85_v28 }
  0x3b   :  { %315 = vmatpush.msrb.mxu0 %v952_v16 }
  0x3d   :  { %316 = vmatpush.msrb.mxu0 %v947_v15 }
  0x3f   :  { %317 = vmatpush.msrb.mxu0 %v942_v14 }
  0x41   :  { %226 = vmatmul.f32.gmra.mxu2 %v185_v29  ;;  %318 = vmatpush.msrb.mxu0 %v937_v13 }
  0x42   :  { %147 = vmatmul.f32.gmra.mxu0 %v1152_v30  ;;  %176 = vmatmul.f32.gmra.mxu1 %v86_v31 }
  0x43   :  { %319 = vmatpush.msrb.mxu0 %v932_v12 }
  0x45   :  { %320 = vmatpush.msrb.mxu0 %v927_v11 }
  0x47   :  { %321 = vmatpush.msrb.mxu0 %v922_v10 }
  0x49   :  { %229 = vmatmul.f32.gmra.mxu2 %v186_v32  ;;  %322 = vmatpush.msrb.mxu0 %v917_v9 }
  0x4a   :  { %150 = vmatmul.f32.gmra.mxu0 %v1159_v33  ;;  %179 = vmatmul.f32.gmra.mxu1 %v87_v34 }
  0x4b   :  { %323 = vmatpush.msrb.mxu0 %v912_v8 }
  0x4d   :  { %324 = vmatpush.msrb.mxu0 %v907_v7 }
  0x4f   :  { %325 = vmatpush.msrb.mxu0 %v902_v5 }
  0x51   :  { %326 = vmatpush.msrb.mxu0 %v897_v4 }
  0x53   :  { %572 = vmatpush.msra.mxu0 %v972_v20 }
  0x55   :  { %573 = vmatpush.msra.mxu0 %v967_v19 }
  0x57   :  { %574 = vmatpush.msra.mxu0 %v962_v18 }
  0x59   :  { %575 = vmatpush.msra.mxu0 %v957_v17 }
  0x5b   :  { %576 = vmatpush.msra.mxu0 %v952_v16 }
  0x5d   :  { %577 = vmatpush.msra.mxu0 %v947_v15 }
  0x5f   :  { %578 = vmatpush.msra.mxu0 %v942_v14 }
  0x61   :  { %579 = vmatpush.msra.mxu0 %v937_v13 }
  0x63   :  { %580 = vmatpush.msra.mxu0 %v932_v12 }
  0x65   :  { %581 = vmatpush.msra.mxu0 %v927_v11 }
  0x67   :  { %582 = vmatpush.msra.mxu0 %v922_v10 }
  0x69   :  { %583 = vmatpush.msra.mxu0 %v917_v9 }
  0x6b   :  { %584 = vmatpush.msra.mxu0 %v912_v8 }
  0x6d   :  { %585 = vmatpush.msra.mxu0 %v907_v7 }
  0x6f   :  { %586 = vmatpush.msra.mxu0 %v902_v5 }
  0x71   :  { %587 = vmatpush.msra.mxu0 %v897_v4 }
  0xaf   :  { %v142_v35 = vpop.f32.mrf.mxu0  ;;  %v171_v36 = vpop.f32.mrf.mxu1 }
  0xb0   :  { %v172_v45 = vadd.f32 %v171_v36, %v142_v35 }
  0xb4   :  { %v221_v37 = vpop.f32.mrf.mxu2 }
  0xb5   :  { %v233_v50 = vadd.f32 %v221_v37, %v172_v45  ;;  %v803_v45 = vld [vmem:[%s1405_s2 + $0xf8] sm:$0xff] }
  0xb6   :  { %449 = vmatpush.msrb.mxu1 %v803_v45  ;;  %v811_v45 = vld [vmem:[%s1405_s2 + $0x138] sm:$0xff] }
  0xb7   :  { %v145_v38 = vpop.f32.mrf.mxu0  ;;  %v174_v39 = vpop.f32.mrf.mxu1 }
  0xb8   :  { %v175_v43 = vadd.f32 %v174_v39, %v145_v38 }
  0xbc   :  { %v224_v40 = vpop.f32.mrf.mxu2 }
  0xbd   :  { %v234_v47 = vadd.f32 %v224_v40, %v175_v43 }
  0xbf   :  { %v148_v41 = vpop.f32.mrf.mxu0  ;;  %v177_v42 = vpop.f32.mrf.mxu1  ;;  %v239_v53 = vadd.f32 %v234_v47, %v233_v50 }
  0xc0   :  { %v178_v46 = vadd.f32 %v177_v42, %v148_v41 }
  0xc4   :  { %v227_v44 = vpop.f32.mrf.mxu2 }
  0xc5   :  { %v235_v51 = vadd.f32 %v227_v44, %v178_v46  ;;  %v427_v44 = vld [vmem:[%s1405_s2 + $0x78] sm:$0xff]  ;;  %v426_v46 = vld [vmem:[%s1405_s2 + $0x70] sm:$0xff] }
  0xc6   :  { %478 = vmatpush.msrb.mxu2 %v427_v44  ;;  %v792_v44 = vld [vmem:[%s1405_s2 + $0xa0] sm:$0xff] }
  0xc7   :  { %v151_v48 = vpop.f32.mrf.mxu0  ;;  %v180_v49 = vpop.f32.mrf.mxu1  ;;  %v240_v55 = vadd.f32 %v239_v53, %v235_v51  ;;  %v423_v53 = vld [vmem:[%s1405_s2 + $0x58] sm:$0xff] }
  0xc8   :  { %v181_v52 = vadd.f32 %v180_v49, %v151_v48  ;;  %v425_v49 = vld [vmem:[%s1405_s2 + $0x68] sm:$0xff]  ;;  %479 = vmatpush.msrb.mxu2 %v426_v46  ;;  %v791_v46 = vld [vmem:[%s1405_s2 + $0x98] sm:$0xff] }
  0xca   :  { %480 = vmatpush.msrb.mxu2 %v425_v49  ;;  %v790_v49 = vld [vmem:[%s1405_s2 + $0x90] sm:$0xff] }
  0xcc   :  { %v230_v54 = vpop.f32.mrf.mxu2 }
  0xcd   :  { %v236_v56 = vadd.f32 %v230_v54, %v181_v52  ;;  %v800_v52 = vld [vmem:[%s1405_s2 + $0xe0] sm:$0xff] }
  0xcf   :  { %v241_v57 = vadd.f32 %v240_v55, %v236_v56 }
  0xd1   :  { %v242_v58 = vrot.slane %v241_v57, 4 }
  0xd3   :  { %v243_v59 = vadd.f32 %v242_v58, %v241_v57 }
  0xd5   :  { %v244_v60 = vrot.slane %v243_v59, 2 }
  0xd7   :  { %v245_v61 = vadd.f32 %v244_v60, %v243_v59  ;;  %v237_v59 = vld [vmem:[%s1406_s3] sm:$0x1] }
  0xd9   :  { %v246_v62 = vrot.slane %v245_v61, 1 }
  0xdb   :  { %v247_v63 = vadd.f32 %v246_v62, %v245_v61 }
  0xdd   :  { %264 = vmatmul.f32.vlgmr.msra.gmra.mxu3 %v247_v63  ;;  %v819_v63 = vld [vmem:[%s1405_s2 + $0x178] sm:$0xff] }
  0xde   :  { %362 = vmatpush.msra.mxu3 %v977_v21 }
 0x160   :  { %v265_v0 = vpop.f32.mrf.mxu3 }
 0x161   :  { %v268_v1 = vmul.f32 0.001953125, %v265_v0  ;;  %v818_v0 = vld [vmem:[%s1405_s2 + $0x170] sm:$0xff] }
 0x163   :  { %785 = vmatmul.msk.f32.vlgmr.msrb.gmra.mxu3 %vm269_vm0, %v268_v1  ;;  %v817_v1 = vld [vmem:[%s1405_s2 + $0x168] sm:$0xff] }
 0x164   :  { %390 = vmatpush.msrb.mxu3 %v977_v21 }
 0x1e6   :  { %v290_v2 = vpop.f32.mrf.mxu3 }
 0x1e7   :  { %v293_v3 = vperm.slane %v290_v2, 0  ;;  %v816_v2 = vld [vmem:[%s1405_s2 + $0x160] sm:$0xff] }
 0x1e9   :  { %v1187_v6 = vsub.f32 %v233_v50, %v293_v3  ;;  %v1189_v22 = vsub.f32 %v234_v47, %v293_v3  ;;  %v1191_v23 = vsub.f32 %v235_v51, %v293_v3  ;;  %v1193_v25 = vsub.f32 %v236_v56, %v293_v3  ;;  %v802_v47 = vld [vmem:[%s1405_s2 + $0xf0] sm:$0xff]  ;;  %v801_v50 = vld [vmem:[%s1405_s2 + $0xe8] sm:$0xff]  ;;  %v424_v51 = vld [vmem:[%s1405_s2 + $0x60] sm:$0xff] }
 0x1ea   :  { %450 = vmatpush.msrb.mxu1 %v802_v47  ;;  %481 = vmatpush.msrb.mxu2 %v424_v51  ;;  %v238_v3 = vld [vmem:[%s1407_s4] sm:$0x1]  ;;  %v418_v47 = vld [vmem:[%s1405_s2 + $0x30] sm:$0xff]  ;;  %v809_v51 = vld [vmem:[%s1405_s2 + $0x128] sm:$0xff] }
 0x1eb   :  { %v298_v26 = vmul.f32 %v1187_v6, %v1187_v6  ;;  %v299_v28 = vmul.f32 %v1189_v22, %v1189_v22  ;;  %v300_v29 = vmul.f32 %v1191_v23, %v1191_v23  ;;  %v301_v32 = vmul.f32 %v1193_v25, %v1193_v25 }
 0x1ec   :  { %451 = vmatpush.msrb.mxu1 %v801_v50  ;;  %482 = vmatpush.msrb.mxu2 %v423_v53  ;;  %v417_v50 = vld [vmem:[%s1405_s2 + $0x28] sm:$0xff]  ;;  %v416_v53 = vld [vmem:[%s1405_s2 + $0x20] sm:$0xff] }
 0x1ed   :  { %v302_v31 = vadd.f32 %v299_v28, %v298_v26  ;;  %v799_v26 = vld [vmem:[%s1405_s2 + $0xd8] sm:$0xff]  ;;  %v798_v28 = vld [vmem:[%s1405_s2 + $0xd0] sm:$0xff] }
 0x1ee   :  { %452 = vmatpush.msrb.mxu1 %v800_v52  ;;  %v789_v52 = vld [vmem:[%s1405_s2 + $0x88] sm:$0xff] }
 0x1ef   :  { %v303_v34 = vadd.f32 %v302_v31, %v300_v29  ;;  %v797_v29 = vld [vmem:[%s1405_s2 + $0xc8] sm:$0xff]  ;;  %v796_v31 = vld [vmem:[%s1405_s2 + $0xc0] sm:$0xff] }
 0x1f0   :  { %453 = vmatpush.msrb.mxu1 %v799_v26 }
 0x1f1   :  { %v304_v35 = vadd.f32 %v303_v34, %v301_v32  ;;  %v815_v32 = vld [vmem:[%s1405_s2 + $0x158] sm:$0xff]  ;;  %v422_v34 = vld [vmem:[%s1405_s2 + $0x50] sm:$0xff] }
 0x1f2   :  { %454 = vmatpush.msrb.mxu1 %v798_v28  ;;  %483 = vmatpush.msrb.mxu2 %v422_v34 }
 0x1f3   :  { %v305_v36 = vrot.slane %v304_v35, 4 }
 0x1f4   :  { %455 = vmatpush.msrb.mxu1 %v797_v29 }
 0x1f5   :  { %v306_v37 = vadd.f32 %v305_v36, %v304_v35  ;;  %v814_v35 = vld [vmem:[%s1405_s2 + $0x150] sm:$0xff]  ;;  %v795_v36 = vld [vmem:[%s1405_s2 + $0xb8] sm:$0xff] }
 0x1f6   :  { %456 = vmatpush.msrb.mxu1 %v796_v31 }
 0x1f7   :  { %v307_v38 = vrot.slane %v306_v37, 2 }
 0x1f8   :  { %457 = vmatpush.msrb.mxu1 %v795_v36 }
 0x1f9   :  { %v308_v39 = vadd.f32 %v307_v38, %v306_v37  ;;  %v421_v37 = vld [vmem:[%s1405_s2 + $0x48] sm:$0xff] }
 0x1fa   :  { %v813_v38 = vld [vmem:[%s1405_s2 + $0x148] sm:$0xff]  ;;  %484 = vmatpush.msrb.mxu2 %v421_v37 }
 0x1fb   :  { %v309_v40 = vrot.slane %v308_v39, 1 }
 0x1fd   :  { %v310_v41 = vadd.f32 %v309_v40, %v308_v39  ;;  %v420_v39 = vld [vmem:[%s1405_s2 + $0x40] sm:$0xff] }
 0x1fe   :  { %v812_v40 = vld [vmem:[%s1405_s2 + $0x140] sm:$0xff]  ;;  %485 = vmatpush.msrb.mxu2 %v420_v39 }
 0x1ff   :  { %327 = vmatmul.f32.vlgmr.msrb.gmra.mxu0 %v310_v41  ;;  %v794_v41 = vld [vmem:[%s1405_s2 + $0xb0] sm:$0xff] }
 0x200   :  { %685 = vmatpush.msrb.mxu0 %v977_v21  ;;  %458 = vmatpush.msrb.mxu1 %v794_v41 }
 0x27c   :  { %v328_v42 = vpop.f32.mrf.mxu0 }
 0x27d   :  { %v331_v43 = vmul.f32 0.001953125, %v328_v42  ;;  %v419_v42 = vld [vmem:[%s1405_s2 + $0x38] sm:$0xff] }
 0x27e   :  { %486 = vmatpush.msrb.mxu2 %v419_v42 }
 0x27f   :  { %v332_v48 = vadd.f32 1e-05, %v331_v43  ;;  %v793_v43 = vld [vmem:[%s1405_s2 + $0xa8] sm:$0xff] }
 0x280   :  { %459 = vmatpush.msrb.mxu1 %v793_v43  ;;  %487 = vmatpush.msrb.mxu2 %v418_v47 }
 0x281   :  { %825 = vrsqrt.f32 %v332_v48  ;;  %vm339_vm2 = vweird.f32 %v332_v48 }
 0x282   :  { %460 = vmatpush.msrb.mxu1 %v792_v44  ;;  %488 = vmatpush.msrb.mxu2 %v417_v50 }
 0x284   :  { %461 = vmatpush.msrb.mxu1 %v791_v46  ;;  %489 = vmatpush.msrb.mxu2 %v416_v53 }
 0x286   :  { %462 = vmatpush.msrb.mxu1 %v790_v49 }
 0x287   :  { %v826_v54 = vpop.eup %825 }
 0x288   :  { %v334_v55 = vmul.f32 %v826_v54, %v332_v48  ;;  %vm340_vm1 = vweird.f32 %v826_v54  ;;  %v810_v48 = vld [vmem:[%s1405_s2 + $0x130] sm:$0xff]  ;;  %463 = vmatpush.msrb.mxu1 %v789_v52 }
 0x289   :  { %vm341_vm3 = vmor %vm339_vm2, %vm340_vm1 }
 0x28a   :  { %v335_v56 = vmul.f32 %v826_v54, %v334_v55  ;;  %v788_v55 = vld [vmem:[%s1405_s2 + $0x80] sm:$0xff] }
 0x28b   :  { %464 = vmatpush.msrb.mxu1 %v788_v55 }
 0x28c   :  { %v336_v57 = vmul.f32 0.5, %v335_v56  ;;  %v415_v56 = vld [vmem:[%s1405_s2 + $0x18] sm:$0xff] }
 0x28d   :  { %490 = vmatpush.msrb.mxu2 %v415_v56  ;;  %611 = vmatpush.msra.mxu1 %v977_v21 }
 0x28e   :  { %v337_v58 = vsub.f32 1.5, %v336_v57  ;;  %v807_v57 = vld [vmem:[%s1405_s2 + $0x118] sm:$0xff] }
 0x290   :  { %v338_v60 = vmul.f32 %v826_v54, %v337_v58  ;;  %v414_v58 = vld [vmem:[%s1405_s2 + $0x10] sm:$0xff] }
 0x291   :  { %491 = vmatpush.msrb.mxu2 %v414_v58 }
 0x292   :  { %v342_v61 = vsel %vm341_vm3, %v826_v54, %v338_v60  ;;  %v808_v54 = vld [vmem:[%s1405_s2 + $0x120] sm:$0xff]  ;;  %v413_v60 = vld [vmem:[%s1405_s2 + $0x8] sm:$0xff] }
 0x293   :  { %v343_v62 = vmul.f32 %v342_v61, %v237_v59  ;;  %v806_v59 = vld [vmem:[%s1405_s2 + $0x110] sm:$0xff]  ;;  %v805_v61 = vld [vmem:[%s1405_s2 + $0x108] sm:$0xff]  ;;  %492 = vmatpush.msrb.mxu2 %v413_v60 }
 0x295   :  { %786 = vmatmul.msk.f32.vlgmr.msra.gmra.mxu3 %vm269_vm0, %v343_v62  ;;  %v412_v62 = vld [vmem:[%s1405_s2] sm:$0xff] }
 0x296   :  { %528 = vmatpush.msra.mxu3 %v819_v63  ;;  %v804_v63 = vld [vmem:[%s1405_s2 + $0x100] sm:$0xff]  ;;  %493 = vmatpush.msrb.mxu2 %v412_v62 }
 0x298   :  { %529 = vmatpush.msra.mxu3 %v818_v0  ;;  %634 = vmatpush.msra.mxu2 %v972_v20 }
 0x29a   :  { %530 = vmatpush.msra.mxu3 %v817_v1  ;;  %635 = vmatpush.msra.mxu2 %v967_v19 }
 0x29c   :  { %531 = vmatpush.msra.mxu3 %v816_v2  ;;  %636 = vmatpush.msra.mxu2 %v962_v18 }
 0x29d   :  { %787 = vmatmul.msk.f32.vlgmr.msrb.gmra.mxu3 %vm269_vm0, %v238_v3 }
 0x29e   :  { %532 = vmatpush.msra.mxu3 %v815_v32  ;;  %637 = vmatpush.msra.mxu2 %v957_v17 }
 0x2a0   :  { %533 = vmatpush.msra.mxu3 %v814_v35  ;;  %638 = vmatpush.msra.mxu2 %v952_v16 }
 0x2a2   :  { %534 = vmatpush.msra.mxu3 %v813_v38  ;;  %639 = vmatpush.msra.mxu2 %v947_v15 }
 0x2a4   :  { %535 = vmatpush.msra.mxu3 %v812_v40  ;;  %640 = vmatpush.msra.mxu2 %v942_v14 }
 0x2a6   :  { %536 = vmatpush.msra.mxu3 %v811_v45  ;;  %641 = vmatpush.msra.mxu2 %v937_v13 }
 0x2a8   :  { %537 = vmatpush.msra.mxu3 %v810_v48  ;;  %642 = vmatpush.msra.mxu2 %v932_v12 }
 0x2aa   :  { %538 = vmatpush.msra.mxu3 %v809_v51  ;;  %643 = vmatpush.msra.mxu2 %v927_v11 }
 0x2ac   :  { %539 = vmatpush.msra.mxu3 %v808_v54  ;;  %644 = vmatpush.msra.mxu2 %v922_v10 }
 0x2ae   :  { %540 = vmatpush.msra.mxu3 %v807_v57  ;;  %645 = vmatpush.msra.mxu2 %v917_v9 }
 0x2b0   :  { %541 = vmatpush.msra.mxu3 %v806_v59  ;;  %646 = vmatpush.msra.mxu2 %v912_v8 }
 0x2b2   :  { %542 = vmatpush.msra.mxu3 %v805_v61  ;;  %647 = vmatpush.msra.mxu2 %v907_v7 }
 0x2b4   :  { %543 = vmatpush.msra.mxu3 %v804_v63  ;;  %648 = vmatpush.msra.mxu2 %v902_v5 }
 0x2b6   :  { %649 = vmatpush.msra.mxu2 %v897_v4 }
 0x318   :  { %v364_v0 = vpop.f32.mrf.mxu3 }
 0x319   :  { %v367_v1 = vperm.slane %v364_v0, 0 }
 0x31b   :  { %v368_v2 = vmul.f32 %v367_v1, %v1187_v6  ;;  %v369_v20 = vmul.f32 %v367_v1, %v1189_v22  ;;  %v370_v19 = vmul.f32 %v367_v1, %v1191_v23  ;;  %v371_v18 = vmul.f32 %v367_v1, %v1193_v25 }
 0x320   :  { %v392_v3 = vpop.f32.mrf.mxu3 }
 0x321   :  { %v395_v26 = vperm.slane %v392_v3, 0 }
 0x323   :  { %v396_v16 = vadd.f32 %v395_v26, %v368_v2  ;;  %v397_v17 = vadd.f32 %v395_v26, %v369_v20  ;;  %v398_v28 = vadd.f32 %v395_v26, %v370_v19  ;;  %v399_v15 = vadd.f32 %v395_v26, %v371_v18 }
 0x325   :  { %v400_v14 = vmax.f32 %v396_v16, 0.0  ;;  %v401_v6 = vmax.f32 %v397_v17, 0.0  ;;  %v402_v29 = vmax.f32 %v398_v28, 0.0  ;;  %v403_v31 = vmax.f32 %v399_v15, 0.0 }
 0x327   :  { %404 = vst [vmem:[#allocation3 + $0x8] sm:$0xff] %v400_v14  ;;  %465 = vmatmul.f32.vlgmr.msrb.gmra.mxu1 %v400_v14 }
 0x328   :  { %405 = vst [vmem:[#allocation3 + $0x10] sm:$0xff] %v401_v6  ;;  %713 = vmatpush.msrb.mxu1 %v977_v21 }
 0x329   :  { %406 = vst [vmem:[#allocation3 + $0x28] sm:$0xff] %v402_v29 }
 0x32a   :  { %407 = vst [vmem:[#allocation3 + $0x30] sm:$0xff] %v403_v31 }
 0x32e   :  { %v408_v11 = vld [vmem:[#allocation3 + $0x7] sm:$0xff] }
 0x32f   :  { %494 = vmatmul.f32.vlgmr.msrb.gmra.mxu2 %v408_v11  ;;  %v507_v12 = vld [vmem:[#allocation3 + $0x9] sm:$0xff]  ;;  %468 = vmatmul.f32.gmra.mxu1 %v401_v6  ;;  %v508_v9 = vld [vmem:[#allocation3 + $0x11] sm:$0xff] }
 0x330   :  { %544 = vmatmul.f32.vlgmr.msra.gmra.mxu3 %v507_v12  ;;  %v409_v10 = vld [vmem:[#allocation3 + $0xf] sm:$0xff]  ;;  %v410_v13 = vld [vmem:[#allocation3 + $0x27] sm:$0xff] }
 0x331   :  { %v509_v21 = vld [vmem:[#allocation3 + $0x29] sm:$0xff]  ;;  %v510_v8 = vld [vmem:[#allocation3 + $0x31] sm:$0xff] }
 0x332   :  { %v411_v7 = vld [vmem:[#allocation3 + $0x2f] sm:$0xff] }
 0x337   :  { %497 = vmatmul.f32.gmra.mxu2 %v409_v10  ;;  %471 = vmatmul.f32.gmra.mxu1 %v402_v29  ;;  %v562_v29 = vld [vmem:[%s1409_s6] sm:$0x1] }
 0x338   :  { %547 = vmatmul.f32.gmra.mxu3 %v508_v9 }
 0x33f   :  { %500 = vmatmul.f32.gmra.mxu2 %v410_v13  ;;  %474 = vmatmul.f32.gmra.mxu1 %v403_v31 }
 0x340   :  { %550 = vmatmul.f32.gmra.mxu3 %v509_v21 }
 0x347   :  { %503 = vmatmul.f32.gmra.mxu2 %v411_v7 }
 0x348   :  { %553 = vmatmul.f32.gmra.mxu3 %v510_v8  ;;  %v561_v8 = vld [vmem:[%s1408_s5] sm:$0x1] }
 0x3a4   :  { %v466_v5 = vpop.f32.mrf.mxu1 }
 0x3ac   :  { %v469_v25 = vpop.f32.mrf.mxu1 }
 0x3b2   :  { %v495_v22 = vpop.f32.mrf.mxu2 }
 0x3b3   :  { %v545_v23 = vpop.f32.mrf.mxu3  ;;  %v496_v38 = vadd.f32 %v495_v22, %v466_v5 }
 0x3b4   :  { %v472_v34 = vpop.f32.mrf.mxu1 }
 0x3b5   :  { %v557_v41 = vadd.f32 %v545_v23, %v496_v38 }
 0x3ba   :  { %v498_v32 = vpop.f32.mrf.mxu2 }
 0x3bb   :  { %v548_v4 = vpop.f32.mrf.mxu3  ;;  %v499_v36 = vadd.f32 %v498_v32, %v469_v25 }
 0x3bc   :  { %v475_v43 = vpop.f32.mrf.mxu1 }
 0x3bd   :  { %v558_v40 = vadd.f32 %v548_v4, %v499_v36 }
 0x3bf   :  { %v563_v45 = vadd.f32 %v558_v40, %v557_v41 }
 0x3c2   :  { %v501_v35 = vpop.f32.mrf.mxu2 }
 0x3c3   :  { %v551_v37 = vpop.f32.mrf.mxu3  ;;  %v502_v39 = vadd.f32 %v501_v35, %v472_v34 }
 0x3c5   :  { %v559_v42 = vadd.f32 %v551_v37, %v502_v39 }
 0x3c7   :  { %v564_v48 = vadd.f32 %v563_v45, %v559_v42 }
 0x3ca   :  { %v504_v44 = vpop.f32.mrf.mxu2 }
 0x3cb   :  { %v505_v46 = vadd.f32 %v504_v44, %v475_v43  ;;  %v554_v47 = vpop.f32.mrf.mxu3 }
 0x3cd   :  { %v560_v49 = vadd.f32 %v554_v47, %v505_v46 }
 0x3cf   :  { %v565_v50 = vadd.f32 %v564_v48, %v560_v49 }
 0x3d1   :  { %v566_v51 = vrot.slane %v565_v50, 4 }
 0x3d3   :  { %v567_v52 = vadd.f32 %v566_v51, %v565_v50 }
 0x3d5   :  { %v568_v53 = vrot.slane %v567_v52, 2 }
 0x3d7   :  { %v569_v54 = vadd.f32 %v568_v53, %v567_v52 }
 0x3d9   :  { %v570_v55 = vrot.slane %v569_v54, 1 }
 0x3db   :  { %v571_v56 = vadd.f32 %v570_v55, %v569_v54 }
 0x3dd   :  { %588 = vmatmul.f32.vlgmr.msra.gmra.mxu0 %v571_v56 }
 0x45a   :  { %v589_v57 = vpop.f32.mrf.mxu0 }
 0x45b   :  { %v592_v58 = vmul.f32 0.001953125, %v589_v57 }
 0x45d   :  { %820 = vmatmul.msk.f32.vlgmr.msra.gmra.mxu1 %vm269_vm0, %v592_v58 }
 0x465   :  { %822 = vmatmul.msk.f32.vlgmr.msrb.gmra.mxu1 %vm269_vm0, %v562_v29 }
 0x4da   :  { %v613_v59 = vpop.f32.mrf.mxu1 }
 0x4db   :  { %v616_v60 = vperm.slane %v613_v59, 0 }
 0x4dd   :  { %v617_v61 = vsub.f32 %v557_v41, %v616_v60  ;;  %v618_v62 = vsub.f32 %v558_v40, %v616_v60  ;;  %v619_v63 = vsub.f32 %v559_v42, %v616_v60  ;;  %v620_v0 = vsub.f32 %v560_v49, %v616_v60 }
 0x4df   :  { %v621_v1 = vmul.f32 %v617_v61, %v617_v61  ;;  %v622_v2 = vmul.f32 %v618_v62, %v618_v62  ;;  %v623_v3 = vmul.f32 %v619_v63, %v619_v63  ;;  %v624_v19 = vmul.f32 %v620_v0, %v620_v0 }
 0x4e1   :  { %v625_v20 = vadd.f32 %v622_v2, %v621_v1 }
 0x4e2   :  { %v715_v25 = vpop.f32.mrf.mxu1 }
 0x4e3   :  { %v626_v18 = vadd.f32 %v625_v20, %v623_v3  ;;  %v718_v34 = vperm.slane %v715_v25, 0 }
 0x4e5   :  { %v627_v26 = vadd.f32 %v626_v18, %v624_v19 }
 0x4e7   :  { %v628_v16 = vrot.slane %v627_v26, 4 }
 0x4e9   :  { %v629_v17 = vadd.f32 %v628_v16, %v627_v26 }
 0x4eb   :  { %v630_v28 = vrot.slane %v629_v17, 2 }
 0x4ed   :  { %v631_v15 = vadd.f32 %v630_v28, %v629_v17 }
 0x4ef   :  { %v632_v14 = vrot.slane %v631_v15, 1 }
 0x4f1   :  { %v633_v6 = vadd.f32 %v632_v14, %v631_v15 }
 0x4f3   :  { %650 = vmatmul.f32.vlgmr.msra.gmra.mxu2 %v633_v6 }
 0x576   :  { %v651_v31 = vpop.f32.mrf.mxu2 }
 0x577   :  { %v654_v11 = vmul.f32 0.001953125, %v651_v31 }
 0x579   :  { %v655_v12 = vadd.f32 1e-05, %v654_v11 }
 0x57b   :  { %827 = vrsqrt.f32 %v655_v12  ;;  %vm662_vm5 = vweird.f32 %v655_v12 }
 0x581   :  { %v828_v10 = vpop.eup %827 }
 0x582   :  { %v657_v9 = vmul.f32 %v828_v10, %v655_v12  ;;  %vm663_vm4 = vweird.f32 %v828_v10 }
 0x583   :  { %vm664_vm6 = vmor %vm662_vm5, %vm663_vm4 }
 0x584   :  { %v658_v13 = vmul.f32 %v828_v10, %v657_v9 }
 0x586   :  { %v659_v21 = vmul.f32 0.5, %v658_v13 }
 0x588   :  { %v660_v7 = vsub.f32 1.5, %v659_v21 }
 0x58a   :  { %v661_v5 = vmul.f32 %v828_v10, %v660_v7 }
 0x58c   :  { %v665_v22 = vsel %vm664_vm6, %v828_v10, %v661_v5 }
 0x58d   :  { %v666_v23 = vmul.f32 %v665_v22, %v561_v8 }
 0x58f   :  { %821 = vmatmul.msk.f32.vlgmr.msrb.gmra.mxu0 %vm269_vm0, %v666_v23 }
 0x60c   :  { %v687_v32 = vpop.f32.mrf.mxu0 }
 0x60d   :  { %v690_v4 = vperm.slane %v687_v32, 0 }
 0x60f   :  { %v691_v35 = vmul.f32 %v690_v4, %v617_v61  ;;  %v692_v36 = vmul.f32 %v690_v4, %v618_v62  ;;  %v693_v37 = vmul.f32 %v690_v4, %v619_v63  ;;  %v694_v38 = vmul.f32 %v690_v4, %v620_v0 }
 0x611   :  { %v719_v39 = vadd.f32 %v718_v34, %v691_v35  ;;  %v720_v40 = vadd.f32 %v718_v34, %v692_v36  ;;  %v721_v41 = vadd.f32 %v718_v34, %v693_v37  ;;  %v722_v42 = vadd.f32 %v718_v34, %v694_v38 }
 0x613   :  { %v727_v43 = vadd.f32 %v719_v39, %v1140_v24  ;;  %v728_v44 = vadd.f32 %v720_v40, %v1145_v27  ;;  %v729_v45 = vadd.f32 %v721_v41, %v1152_v30  ;;  %v730_v46 = vadd.f32 %v722_v42, %v1159_v33 }
 0x615   :  { %v731_v47 = vmax.f32 %v727_v43, 0.0  ;;  %v732_v48 = vmax.f32 %v728_v44, 0.0  ;;  %v733_v49 = vmax.f32 %v729_v45, 0.0  ;;  %v734_v50 = vmax.f32 %v730_v46, 0.0 }
 0x617   :  { %735 = vst [vmem:[%s1412_s9] sm:$0xff] %v731_v47 }
 0x618   :  { %736 = vst [vmem:[%s1412_s9 + $0x8] sm:$0xff] %v732_v48 }
 0x619   :  { %737 = vst [vmem:[%s1412_s9 + $0x10] sm:$0xff] %v733_v49 }
 0x61a   :  { %738 = vst [vmem:[%s1412_s9 + $0x18] sm:$0xff] %v734_v50 }
 0x61b   :  { %743 = vsyncmov [#allocation4] }
 0x61e   :  { %s744_s28 = vpop.sfrf %743 }
 0x61f   :  { %p823_p0 = scmp.ne.s32.totalorder %s744_s28, 0 }
 0x621   :  { %748 = shalt.err (%p823_p0)  }

</bundles_post_ra>
